<compile_context>
chip_gen: v6e
topology: v6e:2x2x1
jax: 0.10.0
libtpu: 0.0.40
codegen_flags: <defaults>
</compile_context>

<pallas_src>
import functools

import jax
import jax.numpy as jnp
from jax.experimental import pallas as pl
from jax.experimental.pallas import tpu as pltpu


# --------------------------------------------------------------------------- #
# Small helpers (device-aware VMEM budgeting / tile picking)
# --------------------------------------------------------------------------- #
def _round_up(x, m):
    return ((x + m - 1) // m) * m


def _device_kind():
    try:
        return jax.devices()[0].device_kind.lower()
    except Exception:
        return ""


def _vmem_budget_bytes(kind):
    if "v7" in kind:
        # 64 MiB physical per core: leave compiler / internal-scratch headroom.
        return 48 * 1024 * 1024
    if any(tag in kind for tag in ("v3", "v4", "v5", "v6")):
        # 128 MiB parts: allow big tiles and the resident V / x^T scratch.
        return 100 * 1024 * 1024
    return 48 * 1024 * 1024  # unknown: conservative


def _vmem_estimate_bytes(C, N, tq, in_itemsize, out_itemsize, c_itemsize):
    """Rough VMEM footprint (layout-padded) for one grid step."""
    c_s, c_l = _round_up(C, 8), _round_up(C, 128)
    n_s, n_l = _round_up(N, 8), _round_up(N, 128)
    tq_l = _round_up(tq, 128)
    return (
        2 * c_s * n_l * in_itemsize                              # x image block (dbl buf)
        + 2 * c_s * tq_l * out_itemsize                          # output tile  (dbl buf)
        + 2 * (2 * c_s * c_l * c_itemsize + 2 * c_s * 128 * 4)   # weights / biases
        + (c_s * n_l + n_s * c_l) * c_itemsize                   # resident V and x^T
        + 3 * n_s * tq_l * 4                                     # energy / prob slabs
    )


def _pick_q_tile(N, C, in_itemsize, out_itemsize, c_itemsize, budget, requested=None):
    if requested is not None:
        if N % requested != 0:
            raise ValueError(f"tq={requested} must divide N={N}")
        return requested
    candidates = [t for t in (512, 256, 128) if N % t == 0]
    if not candidates:
        return N  # small / odd N: one full-width query tile
    for t in candidates:  # biggest tile that leaves VMEM headroom
        if _vmem_estimate_bytes(C, N, t, in_itemsize, out_itemsize, c_itemsize) <= 0.6 * budget:
            return t
    return candidates[-1]


# --------------------------------------------------------------------------- #
# Kernel
# --------------------------------------------------------------------------- #
def _self_attention_kernel(
    x_ref,        # (1, C, N)  input image (f32), single DMA per image
    a_ref,        # (C, C)     M = wq @ wk.T  (folded Q.K), compute_dtype
    rvec_ref,     # (1, C)     (wk @ bq)^T    (key-bias row), f32
    wvT_ref,      # (C, C)     Wv^T, compute_dtype
    bv_ref,       # (C, 1)     value bias, f32
    o_ref,        # (1, C, tq) output tile
    v_sc,         # VMEM (C, N) compute_dtype   resident values
    xT_sc,        # VMEM (N, C) compute_dtype   resident transposed keys (= x^T)
    *,
    tq,
    compute_dtype,
    exp_dtype,
    approx_recip,
    kv_per_tile,
):
    qi = pl.program_id(1)

    def project_keys_values():
        xc = x_ref[0].astype(compute_dtype)                                  # (C, N)
        v = jnp.dot(wvT_ref[...], xc, preferred_element_type=jnp.float32)    # (C, N)
        v_sc[...] = (v + bv_ref[...]).astype(compute_dtype)
        # One transpose per image (amortized over all query tiles).
        xT_sc[...] = jnp.transpose(x_ref[0]).astype(compute_dtype)           # (N, C)

    if kv_per_tile:
        project_keys_values()                 # B==1 path: keep both cores busy
    else:
        pl.when(qi == 0)(project_keys_values)

    # ---- query slab for this tile, sliced out of the resident x^T buffer ----
    start = pl.multiple_of(qi * tq, tq)
    xqT = xT_sc[pl.ds(start, tq), :]                                          # (tq, C)

    # ---- folded Q.K projection: aqT[t, :] = x_t^T M + (wk bq)^T -------------
    aqT = jnp.dot(xqT, a_ref[...], preferred_element_type=jnp.float32)        # (tq, C)
    aqT = (aqT + rvec_ref[...]).astype(compute_dtype)

    # ---- energy^T slab: (N_keys, tq_queries), contraction over C on the MXU -
    e = jax.lax.dot_general(
        xT_sc[...], aqT, (((1,), (1,)), ((), ())),
        preferred_element_type=jnp.float32)                                   # (N, tq) f32

    # ---- softmax over the key axis (axis 0); statistics stay in f32 ---------
    m = jnp.max(e, axis=0, keepdims=True)                                     # (1, tq)
    p = jnp.exp((e - m).astype(exp_dtype))                                    # (N, tq)
    l = jnp.sum(p.astype(jnp.float32), axis=0, keepdims=True)                 # (1, tq)

    # ---- attention-weighted values: plain (C, N) @ (N, tq) MXU matmul -------
    out_un = jnp.dot(v_sc[...], p.astype(compute_dtype),
                     preferred_element_type=jnp.float32)                      # (C, tq)

    # ---- normalize AFTER the PV matmul (C*tq elements, not N*tq) ------------
    inv_l = pl.reciprocal(l, approx=True) if approx_recip else 1.0 / l
    o_ref[0] = (out_un * inv_l).astype(o_ref.dtype)


# --------------------------------------------------------------------------- #
# Wrapper
# --------------------------------------------------------------------------- #
def self_attention_pallas(x_nchw, wq, bq, wk, bk, wv, bv, *,
                          tq=None, compute_dtype=jnp.bfloat16, kv_per_tile=None):
    """SelfAttention forward.

    x_nchw: (B, C, H, W).  Weights stored as (Cin, Cout) (transpose of the
    PyTorch conv weight): wq/wk (C, C//8), wv (C, C); biases (C//8,), (C//8,),
    (C,).  `bk` only shifts the pre-softmax energy by a per-query constant, so
    it is folded out exactly and never reaches the kernel.
    """
    B, C, H, W = x_nchw.shape
    N = H * W

    kind = _device_kind()
    budget = _vmem_budget_bytes(kind)
    in_itemsize = jnp.dtype(x_nchw.dtype).itemsize
    c_itemsize = jnp.dtype(compute_dtype).itemsize
    tq = _pick_q_tile(N, C, in_itemsize, in_itemsize, c_itemsize, budget, tq)
    n_q = N // tq

    # NCHW -> (B, C, N): spatial positions on the lane dim; no wrapper transposes.
    x_cn = x_nchw.reshape(B, C, N)

    # ---- fold the query/key projections (review item 2) --------------------
    hp = jax.lax.Precision.HIGHEST
    a_qk = jnp.dot(wq, jnp.transpose(wk), precision=hp).astype(compute_dtype)  # (C, C)
    rvec = jnp.dot(wk, bq, precision=hp).reshape(1, C)                          # (1, C) f32
    wvT = jnp.transpose(wv).astype(compute_dtype)                               # (C, C)
    bv2 = bv.reshape(C, 1)                                                      # f32

    if kv_per_tile is None:
        # B == 1 would leave one v7x TensorCore idle with a batch-parallel grid;
        # recompute V / x^T per tile and parallelize the query-tile axis instead.
        kv_per_tile = (B == 1 and n_q > 1)

    # bf16 exp only where the EUP supports bf16 (v6e / v7x); f32 elsewhere.
    bf16_eup = ("v6" in kind) or ("v7" in kind)
    use_bf16_compute = jnp.dtype(compute_dtype) != jnp.dtype(jnp.float32)
    exp_dtype = compute_dtype if (use_bf16_compute and bf16_eup) else jnp.float32

    kernel = functools.partial(
        _self_attention_kernel,
        tq=tq,
        compute_dtype=compute_dtype,
        exp_dtype=exp_dtype,
        approx_recip=use_bf16_compute,
        kv_per_tile=kv_per_tile,
    )

    vmem_est = _vmem_estimate_bytes(C, N, tq, in_itemsize, in_itemsize, c_itemsize)
    vmem_limit = int(min(budget, max(int(1.5 * vmem_est), 32 * 1024 * 1024)))
    # TODO(synk): for N large enough that the resident V / x^T scratch no longer
    # fits the per-generation budget (notably v7x's 64 MiB), switch to streamed
    # KV tiles (third grid axis with an online softmax) instead of residency.

    out_cn = pl.pallas_call(
        kernel,
        out_shape=jax.ShapeDtypeStruct((B, C, N), x_nchw.dtype),
        grid_spec=pltpu.PrefetchScalarGridSpec(
            num_scalar_prefetch=0,
            grid=(B, n_q),
            in_specs=[
                # Full image, constant index along the query-tile axis ->
                # exactly one x DMA per image (review item 1).
                pl.BlockSpec((1, C, N), lambda b, qi: (b, 0, 0)),
                pl.BlockSpec((C, C), lambda b, qi: (0, 0)),   # folded M = wq wk^T
                pl.BlockSpec((1, C), lambda b, qi: (0, 0)),   # (wk bq)^T row
                pl.BlockSpec((C, C), lambda b, qi: (0, 0)),   # Wv^T
                pl.BlockSpec((C, 1), lambda b, qi: (0, 0)),   # bv
            ],
            out_specs=pl.BlockSpec((1, C, tq), lambda b, qi: (b, 0, qi)),
            scratch_shapes=[
                pltpu.VMEM((C, N), compute_dtype),   # resident V
                pltpu.VMEM((N, C), compute_dtype),   # resident x^T (keys)
            ],
        ),
        compiler_params=pltpu.CompilerParams(
            dimension_semantics=("parallel",
                                 "parallel" if kv_per_tile else "arbitrary"),
            vmem_limit_bytes=vmem_limit,
        ),
    )(x_cn, a_qk, rvec, wvT, bv2)

    return out_cn.reshape(B, C, H, W)


# --------------------------------------------------------------------------- #
# Pure-JAX reference (mirrors the PyTorch forward exactly)
# --------------------------------------------------------------------------- #
def self_attention_reference(x_nchw, wq, bq, wk, bk, wv, bv):
    B, C, H, W = x_nchw.shape
    N = H * W
    hp = jax.lax.Precision.HIGHEST
    xf = x_nchw.reshape(B, C, N)                                          # (B, C, N)
    q = jnp.einsum("co,bcn->bon", wq, xf, precision=hp) + bq[None, :, None]
    k = jnp.einsum("co,bcn->bon", wk, xf, precision=hp) + bk[None, :, None]
    v = jnp.einsum("co,bcn->bon", wv, xf, precision=hp) + bv[None, :, None]
    energy = jnp.einsum("bcn,bcm->bnm", q, k, precision=hp)               # (B, N, N)
    attn = jax.nn.softmax(energy, axis=-1)
    out = jnp.einsum("bcn,bmn->bcm", v, attn, precision=hp)               # value @ attn^T
    return out.reshape(B, C, H, W)


# --------------------------------------------------------------------------- #
# Self-test
# --------------------------------------------------------------------------- #
if __name__ == "__main__":
    # Small shapes consistent with the module (in_channels must be >= 8).
    B, C, H, W = 2, 32, 16, 16          # N = 256, Cq = C // 8 = 4
    Cq = C // 8

    key = jax.random.PRNGKey(0)
    k_x, k_wq, k_bq, k_wk, k_bk, k_wv, k_bv = jax.random.split(key, 7)

    x = jax.random.normal(k_x, (B, C, H, W), dtype=jnp.float32)
    scale = 1.0 / jnp.sqrt(jnp.float32(C))
    wq = jax.random.normal(k_wq, (C, Cq), dtype=jnp.float32) * scale
    bq = jax.random.normal(k_bq, (Cq,), dtype=jnp.float32) * 0.1
    wk = jax.random.normal(k_wk, (C, Cq), dtype=jnp.float32) * scale
    bk = jax.random.normal(k_bk, (Cq,), dtype=jnp.float32) * 0.1
    wv = jax.random.normal(k_wv, (C, C), dtype=jnp.float32) * scale
    bv = jax.random.normal(k_bv, (C,), dtype=jnp.float32) * 0.1

    ref = self_attention_reference(x, wq, bq, wk, bk, wv, bv)
    ref_scale = jnp.max(jnp.abs(ref)) + 1e-6

    # f32 MXU path, tq=128 -> 2 query tiles per image, so the resident V / x^T
    # scratch and the query-tile loop are actually exercised.
    out_f32 = jax.block_until_ready(
        self_attention_pallas(x, wq, bq, wk, bk, wv, bv,
                              tq=128, compute_dtype=jnp.float32))
    assert out_f32.shape == (B, C, H, W)
    err_f32 = float(jnp.max(jnp.abs(out_f32 - ref)) / ref_scale)
    assert err_f32 < 3e-2, f"f32 Pallas kernel mismatch vs reference: {err_f32}"

    # Fast path: bf16 MXU operands, f32 accumulation / softmax statistics,
    # EUP approximate reciprocal for the normalization.
    out_bf16 = jax.block_until_ready(
        self_attention_pallas(x, wq, bq, wk, bk, wv, bv, tq=128))
    err_bf16 = float(jnp.max(jnp.abs(out_bf16 - ref)) / ref_scale)
    assert err_bf16 < 1e-1, f"bf16 Pallas kernel error too large: {err_bf16}"

    # Auto tile pick (single 256-wide query tile for this N).
    out_auto = jax.block_until_ready(
        self_attention_pallas(x, wq, bq, wk, bk, wv, bv))
    err_auto = float(jnp.max(jnp.abs(out_auto - ref)) / ref_scale)
    assert err_auto < 1e-1, f"auto-tile Pallas kernel error too large: {err_auto}"

    print("KERNEL_OK")
</pallas_src>

<mosaic_0001>
module attributes {stable_mosaic.version = 11 : i64} {
  func.func @_self_attention_kernel(%arg0: i32, %arg1: i32, %arg2: memref<1x32x256xf32, #tpu.memory_space<vmem>>, %arg3: memref<32x32xf32, #tpu.memory_space<vmem>>, %arg4: memref<1x32xf32, #tpu.memory_space<vmem>>, %arg5: memref<32x32xf32, #tpu.memory_space<vmem>>, %arg6: memref<32x1xf32, #tpu.memory_space<vmem>>, %arg7: memref<1x32x128xf32, #tpu.memory_space<vmem>>, %arg8: memref<32x256xf32, #tpu.memory_space<vmem>>, %arg9: memref<256x32xf32, #tpu.memory_space<vmem>>) attributes {dimension_semantics = [#tpu.dimension_semantics<parallel>, #tpu.dimension_semantics<arbitrary>], iteration_bounds = array<i64: 2, 2>, scalar_prefetch = 0 : i64, scratch_operands = 2 : i64, tpu.core_type = #tpu.core_type<tc>, window_params = [{transform_indices = @transform_0, window_bounds = array<i64: 1, 32, 256>}, {pipeline_mode = #tpu.pipeline_mode<synchronous>, transform_indices = @transform_1, window_bounds = array<i64: 32, 32>}, {pipeline_mode = #tpu.pipeline_mode<synchronous>, transform_indices = @transform_2, window_bounds = array<i64: 1, 32>}, {pipeline_mode = #tpu.pipeline_mode<synchronous>, transform_indices = @transform_3, window_bounds = array<i64: 32, 32>}, {pipeline_mode = #tpu.pipeline_mode<synchronous>, transform_indices = @transform_4, window_bounds = array<i64: 32, 1>}, {transform_indices = @transform_5, window_bounds = array<i64: 1, 32, 128>}]} {
    %c0_i32 = arith.constant 0 : i32
    %0 = arith.cmpi eq, %arg1, %c0_i32 : i32
    %1 = arith.extui %0 : i1 to i32
    %c0_i32_0 = arith.constant 0 : i32
    %2 = arith.cmpi ne, %1, %c0_i32_0 : i32
    scf.if %2 {
      %c0_17 = arith.constant 0 : index
      %c0_18 = arith.constant 0 : index
      %c0_19 = arith.constant 0 : index
      %30 = vector.load %arg2[%c0_17, %c0_18, %c0_19] : memref<1x32x256xf32, #tpu.memory_space<vmem>>, vector<1x32x256xf32>
      %31 = vector.shape_cast %30 : vector<1x32x256xf32> to vector<32x256xf32>
      %c0_20 = arith.constant 0 : index
      %c0_21 = arith.constant 0 : index
      %32 = vector.load %arg5[%c0_20, %c0_21] : memref<32x32xf32, #tpu.memory_space<vmem>>, vector<32x32xf32>
      %cst_22 = arith.constant dense<0.000000e+00> : vector<32x256xf32>
      %33 = tpu.matmul %32, %31, %cst_22 {dimension_numbers = #tpu.dot_dimension_numbers<[1], [0], [0], [1], [0, 0, 1, 1], [], []>} : vector<32x32xf32>, vector<32x256xf32>, vector<32x256xf32> -> vector<32x256xf32>
      %c0_23 = arith.constant 0 : index
      %c0_24 = arith.constant 0 : index
      %34 = vector.load %arg6[%c0_23, %c0_24] : memref<32x1xf32, #tpu.memory_space<vmem>>, vector<32x1xf32>
      %35 = vector.broadcast %34 : vector<32x1xf32> to vector<32x256xf32>
      %36 = arith.addf %33, %35 : vector<32x256xf32>
      %c0_25 = arith.constant 0 : index
      %c0_26 = arith.constant 0 : index
      %37 = vector.load %arg8[%c0_25, %c0_26] : memref<32x256xf32, #tpu.memory_space<vmem>>, vector<32x256xf32>
      tpu.vector_store %arg8[%c0_25, %c0_26], %36 {strides = array<i32>} : memref<32x256xf32, #tpu.memory_space<vmem>>, vector<32x256xf32>,
      %c0_27 = arith.constant 0 : index
      %c0_28 = arith.constant 0 : index
      %c0_29 = arith.constant 0 : index
      %38 = vector.load %arg2[%c0_27, %c0_28, %c0_29] : memref<1x32x256xf32, #tpu.memory_space<vmem>>, vector<1x32x256xf32>
      %39 = vector.shape_cast %38 : vector<1x32x256xf32> to vector<32x256xf32>
      %40 = tpu.transpose %39, [1, 0] : vector<32x256xf32> -> vector<256x32xf32>
      %c0_30 = arith.constant 0 : index
      %c0_31 = arith.constant 0 : index
      %41 = vector.load %arg9[%c0_30, %c0_31] : memref<256x32xf32, #tpu.memory_space<vmem>>, vector<256x32xf32>
      tpu.vector_store %arg9[%c0_30, %c0_31], %40 {strides = array<i32>} : memref<256x32xf32, #tpu.memory_space<vmem>>, vector<256x32xf32>,
    } else {
    }
    %c128_i32 = arith.constant 128 : i32
    %3 = arith.muli %arg1, %c128_i32 : i32
    %4 = tpu.assume_multiple %3, 128 : i32
    %5 = arith.index_cast %4 : i32 to index
    %c0 = arith.constant 0 : index
    %6 = vector.load %arg9[%5, %c0] : memref<256x32xf32, #tpu.memory_space<vmem>>, vector<128x32xf32>
    %c0_1 = arith.constant 0 : index
    %c0_2 = arith.constant 0 : index
    %7 = vector.load %arg3[%c0_1, %c0_2] : memref<32x32xf32, #tpu.memory_space<vmem>>, vector<32x32xf32>
    %cst = arith.constant dense<0.000000e+00> : vector<128x32xf32>
    %8 = tpu.matmul %6, %7, %cst {dimension_numbers = #tpu.dot_dimension_numbers<[1], [0], [0], [1], [0, 0, 1, 1], [], []>} : vector<128x32xf32>, vector<32x32xf32>, vector<128x32xf32> -> vector<128x32xf32>
    %c0_3 = arith.constant 0 : index
    %c0_4 = arith.constant 0 : index
    %9 = vector.load %arg4[%c0_3, %c0_4] : memref<1x32xf32, #tpu.memory_space<vmem>>, vector<1x32xf32>
    %10 = vector.broadcast %9 : vector<1x32xf32> to vector<128x32xf32>
    %11 = arith.addf %8, %10 : vector<128x32xf32>
    %c0_5 = arith.constant 0 : index
    %c0_6 = arith.constant 0 : index
    %12 = vector.load %arg9[%c0_5, %c0_6] : memref<256x32xf32, #tpu.memory_space<vmem>>, vector<256x32xf32>
    %cst_7 = arith.constant dense<0.000000e+00> : vector<256x128xf32>
    %13 = tpu.matmul %12, %11, %cst_7 {dimension_numbers = #tpu.dot_dimension_numbers<[1], [1], [0], [0], [0, 0, 1, 0], [], []>} : vector<256x32xf32>, vector<128x32xf32>, vector<256x128xf32> -> vector<256x128xf32>
    %cst_8 = arith.constant dense<0xFF800000> : vector<128xf32>
    %14 = vector.multi_reduction <maximumf>, %13, %cst_8 [0] : vector<256x128xf32> to vector<128xf32>
    %15 = vector.shape_cast %14 : vector<128xf32> to vector<1x128xf32>
    %16 = vector.broadcast %15 : vector<1x128xf32> to vector<256x128xf32>
    %17 = arith.subf %13, %16 : vector<256x128xf32>
    %18 = math.exp %17 : vector<256x128xf32>
    %cst_9 = arith.constant dense<0.000000e+00> : vector<128xf32>
    %19 = vector.multi_reduction <add>, %18, %cst_9 [0] : vector<256x128xf32> to vector<128xf32>
    %20 = vector.shape_cast %19 : vector<128xf32> to vector<1x128xf32>
    %c0_10 = arith.constant 0 : index
    %c0_11 = arith.constant 0 : index
    %21 = vector.load %arg8[%c0_10, %c0_11] : memref<32x256xf32, #tpu.memory_space<vmem>>, vector<32x256xf32>
    %cst_12 = arith.constant dense<0.000000e+00> : vector<32x128xf32>
    %22 = tpu.matmul %21, %18, %cst_12 {dimension_numbers = #tpu.dot_dimension_numbers<[1], [0], [0], [1], [0, 0, 1, 1], [], []>} : vector<32x256xf32>, vector<256x128xf32>, vector<32x128xf32> -> vector<32x128xf32>
    %cst_13 = arith.constant 1.000000e+00 : f32
    %23 = vector.broadcast %cst_13 : f32 to vector<1x128xf32>
    %24 = arith.divf %23, %20 : vector<1x128xf32>
    %25 = vector.broadcast %24 : vector<1x128xf32> to vector<32x128xf32>
    %26 = arith.mulf %22, %25 : vector<32x128xf32>
    %c0_14 = arith.constant 0 : index
    %c0_15 = arith.constant 0 : index
    %c0_16 = arith.constant 0 : index
    %27 = vector.load %arg7[%c0_14, %c0_15, %c0_16] : memref<1x32x128xf32, #tpu.memory_space<vmem>>, vector<1x32x128xf32>
    %28 = vector.shape_cast %27 : vector<1x32x128xf32> to vector<32x128xf32>
    %29 = vector.shape_cast %26 : vector<32x128xf32> to vector<1x32x128xf32>
    tpu.vector_store %arg7[%c0_14, %c0_15, %c0_16], %29 {strides = array<i32>} : memref<1x32x128xf32, #tpu.memory_space<vmem>>, vector<1x32x128xf32>,
    return
  }
  func.func @transform_0(%arg0: i32, %arg1: i32) -> (i32, i32, i32) {
    %c0_i32 = arith.constant 0 : i32
    %c0_i32_0 = arith.constant 0 : i32
    %c0_i32_1 = arith.constant 0 : i32
    return %arg0, %c0_i32, %c0_i32_0 : i32, i32, i32
  }
  func.func @transform_1(%arg0: i32, %arg1: i32) -> (i32, i32) {
    %c0_i32 = arith.constant 0 : i32
    %c0_i32_0 = arith.constant 0 : i32
    %c0_i32_1 = arith.constant 0 : i32
    return %c0_i32, %c0_i32_0 : i32, i32
  }
  func.func @transform_2(%arg0: i32, %arg1: i32) -> (i32, i32) {
    %c0_i32 = arith.constant 0 : i32
    %c0_i32_0 = arith.constant 0 : i32
    %c0_i32_1 = arith.constant 0 : i32
    return %c0_i32, %c0_i32_0 : i32, i32
  }
  func.func @transform_3(%arg0: i32, %arg1: i32) -> (i32, i32) {
    %c0_i32 = arith.constant 0 : i32
    %c0_i32_0 = arith.constant 0 : i32
    %c0_i32_1 = arith.constant 0 : i32
    return %c0_i32, %c0_i32_0 : i32, i32
  }
  func.func @transform_4(%arg0: i32, %arg1: i32) -> (i32, i32) {
    %c0_i32 = arith.constant 0 : i32
    %c0_i32_0 = arith.constant 0 : i32
    %c0_i32_1 = arith.constant 0 : i32
    return %c0_i32, %c0_i32_0 : i32, i32
  }
  func.func @transform_5(%arg0: i32, %arg1: i32) -> (i32, i32, i32) {
    %c0_i32 = arith.constant 0 : i32
    %c0_i32_0 = arith.constant 0 : i32
    return %arg0, %c0_i32, %arg1 : i32, i32, i32
  }
}

</mosaic_0001>

<bundles_post_ra>
// kernel: tpu_custom_call.1
= control target key start
LH: loop header
LB: loop body
LE: loop exit
PB: predicated region body
PF: predicated region fallthrough
CT: control target
= control target key end

     0   :  { %s2889_s0 = inlined_call_operand.hbm [shape: f32[2,32,256], index: 0, kind: input, shape index: {}]   ;;  %s2890_s1 = inlined_call_operand.vmem [shape: f32[32,32], index: 1, kind: input, shape index: {}]   ;;  %s2891_s2 = inlined_call_operand.vmem [shape: f32[1,32], index: 2, kind: input, shape index: {}]   ;;  %s2892_s3 = inlined_call_operand.hbm [shape: f32[32,32], index: 3, kind: input, shape index: {}]   ;;  %s2893_s4 = inlined_call_operand.vmem [shape: f32[32,1], index: 4, kind: input, shape index: {}]   ;;  %s2894_s5 = inlined_call_operand.hbm [shape: f32[2,32,256], index: 5, kind: output, shape index: {}]  }
   0x1   :  { %2904 = sst [smem:[#allocation20_spill]] %s2892_s3 }
   0x2   :  { %2905 = sst [smem:[#allocation21_spill]] %s2894_s5 }
   0x3   :  { %10 = vsyncpa [#allocation5], 0 }
   0x4   :  { %12 = vsyncpa [#allocation5 + $0x1], 0 }
   0x5   :  { %13 = vsyncpa [#allocation8], 0 }
   0x6   :  { %14 = vsyncpa [#allocation6], 0 }
   0x7   :  { %16 = vsyncpa [#allocation6 + $0x1], 0  ;;  %s2269_s18 = smov 0   ;;  %s2271_s19 = smov 0  }
   0x8   :  { %s2273_s20 = smov 0   ;;  %s2275_s21 = smov 0  }
   0x9   :  { %s2277_s22 = smov 0   ;;  %s2279_s23 = smov 0  }
   0xa   :  { %s2281_s24 = smov 0   ;;  %s2283_s25 = smov 0  }
   0xb   :  { %s2285_s26 = smov 0   ;;  %s2287_s27 = smov 0  }
   0xc   :  { %s2289_s28 = smov 0  }
   0xd LB: > { %2906 = sst [smem:[#allocation13_spill]] %s2185_s18  ;;  %s1536_s29 = sadd.s32 4294967295, %s2225_s28   ;;  %s2225_s28 = sphi %s2289_s28, %s22_s28   ;;  %s2221_s27 = sphi %s2287_s27, %s2940_s27   ;;  %s2217_s26 = sphi %s2285_s26, %s2939_s26   ;;  %s2213_s25 = sphi %s2283_s25, %s2938_s25   ;;  %s2209_s24 = sphi %s2281_s24, %s2929_s24   ;;  %s2205_s23 = sphi %s2279_s23, %s2937_s23   ;;  %s2201_s22 = sphi %s2277_s22, %s2936_s22   ;;  %s2197_s21 = sphi %s2275_s21, %s2935_s21   ;;  %s2193_s20 = sphi %s2273_s20, %s2934_s20   ;;  %s2189_s19 = sphi %s2271_s19, %s2933_s19   ;;  %s2185_s18 = sphi %s2269_s18, %s2932_s18  }
   0xe   : > { %2907 = sst [smem:[#allocation14_spill]] %s2213_s25  ;;  %s1537_s30 = sadd.s32 4294967294, %s2225_s28  }
   0xf   : > { %2908 = sst [smem:[#allocation15_spill]] %s2217_s26  ;;  %p54_p0 = scmp.ne.s32.totalorder %s2201_s22, %s2197_s21 }
  0x10   : > { %p2325_p1 = scmp.eq.s32.totalorder %s1536_s29, 0  ;;  %p163_p2 = scmp.ne.s32.totalorder %s2193_s20, %s2189_s19 }
  0x11   : > { %p164_p4 = scmp.eq.s32.totalorder %s1536_s29, 3  ;;  %p169_p5 = scmp.ne.s32.totalorder %s2189_s19, %s2185_s18 }
  0x12   : > { %p2334_p3 = por %p2325_p1, %p54_p0  ;;  %p170_p6 = scmp.eq.s32.totalorder %s1537_s30, 3 }
  0x13   : > { %p2340_p7 = por %p164_p4, %p163_p2  ;;  %p1538_p8 = scmp.ge.s32.totalorder %s2225_s28, 1 }
  0x14   : > { %p2345_p9 = por %p170_p6, %p169_p5  ;;  %p177_p10 = scmp.lt.s32.totalorder %s2225_s28, 5 }
  0x15   : > { %s2911_s9 = scalar_select %p2340_p7, 1, 0 }
  0x16   : > { %s2913_s10 = scalar_select %p2345_p9, 1, 0 }
  0x17   : > { %2912 = sst [smem:[#allocation16_spill]] %s2911_s9  ;;  %p2350_p11 = pnand %p1538_p8, %p177_p10 }
  0x18   : > { %2914 = sst [smem:[#allocation17_spill]] %s2913_s10  ;;  %s2227_s12 = smov [#allocation7]  }
  0x19   : > { %s195_s13 = sshll.u32 %s2227_s12, 4  ;;  %p1865_p12 = pneg %p2350_p11  ;;  %s196_s13 = int_to_ptr.vmem [resolvable:$true] %s195_s13 }
  0x1a   : > { %s2058_s14 = scalar_lea.vmem %s196_s13, 512  ;;  %p2066_p6 = scmp.lt.s32.totalorder %s196_s13, %s196_s13 }
  0x1b   : > { %p1866_p13 = pnand %p1865_p12, %p2325_p1  ;;  %p2059_p2 = scmp.ne.s32.totalorder %s196_s13, %s2058_s14 }
  0x1c   : > { %p2067_p9 = scmp.lt.s32.totalorder %s2058_s14, %s2058_s14 }
  0x1d   : > { %p2049_p0 = pneg %p1866_p13 }
  0x1e   : > { %p2068_p7 = por %p2067_p9, %p2066_p6 }
  0x1f   : > { %p2061_p4 = pnand %p2059_p2, %p2049_p0 }
  0x21   : > { %p2062_p5 = pneg %p2061_p4 }
  0x23   : > { %p2069_p8 = pnand %p2068_p7, %p2062_p5 }
  0x25   : > { %2072 = shalt.err (!%p2069_p8)
}
  0x26   : > { %s2228_s15 = smov 128   ;;  %s2229_s16 = smov 8  }
  0x27   : > { %s2916_s3 = sld [smem:[#allocation20_spill]]  ;;  %s31_s29 = sadd.s32 1, %s2217_s26 }
  0x28   : > { %p32_p7 = scmp.ge.s32.totalorder %s31_s29, 2  ;;  %s34_s30 = sadd.s32 1, %s2221_s27 }
  0x29   : > { %s41_s12 = sadd.s32 1, %s2205_s23  ;;  %p48_p9 = scmp.ne.s32.totalorder %s2205_s23, %s2201_s22 }
  0x2a   : > { %s2942_s29 = smov (%p32_p7, %s31_s29), 0  ;;  %s2944_s30 = smov (!%p32_p7, %s34_s30), %s2221_s27 }
  0x2b   : > { %2917 = sst [smem:[#allocation18_spill]] %s2942_s29  ;;  %p49_p10 = scmp.eq.s32.totalorder %s2225_s28, 0 }
  0x2c   : > { %s149_s14 = ssub.s32 %s2217_s26, %s2942_s29  ;;  %p36_p12 = scmp.ge.s32.totalorder %s2944_s30, 2 }
  0x2d   : > { %1868 = dma.hbm_to_vmem [thread:$0]  (!%p1866_p13), %s2916_s3, 512, %s196_s13, [#allocation8], %s2228_s15, %s2228_s15, %s2229_s16  }
  0x2e   : > { %p1878_p0 = scmp.lt.s32.totalorder %s2225_s28, 4  ;;  %p2373_p13 = por %p49_p10, %p48_p9 }
  0x2f   : > { %s212_s15 = sand.u32 1, %s2205_s23   ;;  %s2946_s30 = smov (%p36_p12, %s2944_s30), 0 }
  0x30   : > { %2919 = sst [smem:[#allocation19_spill]] %s2946_s30  ;;  %s1541_s16 = sshll.u32 %s212_s15, 6 }
  0x31   : > { %s38_s17 = ssub.s32 %s2221_s27, %s2946_s30  ;;  %s1624_s7 = sshll.u32 %s2221_s27, 10 }
  0x32   : > { %p39_p2 = scmp.eq.s32.totalorder %s38_s17, 0  ;;  %s150_s21 = sor.u32 %s149_s14, %s38_s17 }
  0x33   : > { %p151_p4 = scmp.eq.s32.totalorder %s150_s21, 0  ;;  %s2920_s29 = sadd.s32 1, %s2193_s20 }
  0x34   : > { %s2384_s3 = scalar_select %p39_p2, %s2205_s23, %s41_s12  }
  0x35   : > { %s2389_s26 = scalar_select %p151_p4, %s2193_s20, %s2920_s29  }
  0x36   : > { %s222_s5 = scalar_lea.hbm %s2889_s0, %s1624_s7  ;;  %s216_s9 = scalar_lea.vmem [#allocation4], %s1541_s16 }
  0x37   : > { %s223_s25 = sshll.u32 %s216_s9, 4  ;;  %p2398_p5 = pnand %p1878_p0, %p2373_p13  ;;  %s224_s25 = int_to_ptr.vmem [resolvable:$true] %s223_s25 }
  0x38   : > { %s213_s14 = scalar_lea.sflag [#allocation5], %s212_s15  ;;  %s2086_s12 = scalar_lea.vmem %s224_s25, 1024 }
  0x39   : > { %p2075_p6 = pneg %p2398_p5  ;;  %p2087_p8 = scmp.ne.s32.totalorder %s224_s25, %s2086_s12 }
  0x3a   : > { %s2230_s29 = smov [#allocation4]  }
  0x3b   : > { %p2089_p7 = pnand %p2087_p8, %p2075_p6  ;;  %s2091_s18 = sshll.u32 %s2230_s29, 4  ;;  %s2092_s18 = int_to_ptr.vmem [resolvable:$false] %s2091_s18 }
  0x3c   : > { %s2093_s7 = scalar_lea.vmem %s2092_s18, 2048  ;;  %p2094_p10 = scmp.lt.s32.totalorder %s224_s25, %s2092_s18 }
  0x3d   : > { %p2090_p9 = pneg %p2089_p7  ;;  %p2095_p12 = scmp.lt.s32.totalorder %s2093_s7, %s2086_s12 }
  0x3f   : > { %p2096_p2 = por %p2095_p12, %p2094_p10 }
  0x41   : > { %p2097_p4 = pnand %p2096_p2, %p2090_p9 }
  0x43   : > { %2100 = shalt.err (!%p2097_p4)
}
  0x44   : > { %s2231_s9 = smov 256   ;;  %s2232_s10 = smov 16  }
  0x45   : > { %1872 = dma.hbm_to_vmem [thread:$0]  (!%p2398_p5), %s222_s5, 1024, %s224_s25, %s213_s14, %s2231_s9, %s2231_s9, %s2232_s10  }
  0x46   : > { %235 = sbr.rel (%p2350_p11) target bundleno = 1181 (0x49d), region = 40  ;;  %s237_s13 = sand.u32 (!%p2350_p11), 1, %s2201_s22  }
  0x47   : > { %s1545_s15 = sshll.u32 (!%p2350_p11), %s237_s13, 6  ;;  %s238_s16 = scalar_lea.sflag (!%p2350_p11), [#allocation5], %s237_s13 }
  0x48   : > { %s2409_s17 = scalar_lea.vmem (!%p2350_p11), [#allocation4], %s1545_s15 }
  0x4b   : > { %2172 = dma.done.wait (%p2334_p3), %s238_s16, 1024  }
  0x4c   : > { %2174 = vsyncadd (%p2334_p3), %s238_s16, 4294966272 }
  0x4d   : > { %2176 = dma.done.wait (%p2325_p1), [#allocation8], 512  }
  0x4e   : > { %2178 = vsyncadd (%p2325_p1), [#allocation8], 4294966784  ;;  %s269_s5 = sand.u32 1, %s2189_s19   ;;  %p1548_p11 = scmp.ne.s32.totalorder %s2209_s24, 0 }
  0x4f   : > { %s1547_s25 = sshll.u32 %s269_s5, 5 }
  0x50   : > { %s2422_s11 = scalar_lea.vmem [#allocation9], %s1547_s25  ;;  %275 = sbr.rel (%p1548_p11) target bundleno = 319 (0x13f), region = 52 }
  0x55   : > { %v283_v0 = vld [vmem:[%s2409_s17 + $0x38] sm:$0xff]  ;;  %v290_v1 = vld [vmem:[%s2893_s4 + $0x10] sm:$0xff]  ;;  %v2233_v3 = vmov 0   ;;  %v281_v4 = vld [vmem:[%s2409_s17 + $0x28] sm:$0xff]  ;;  %v2234_v11 = vmov 0.0   ;;  %vm312_vm0 = vcmask 261120  }
  0x56   : > { %v282_v2 = vld [vmem:[%s2409_s17 + $0x30] sm:$0xff]  ;;  %1980 = vset.pattern.permute.xlu1 %v2233_v3  ;;  %349 = vmatprep.subr.mxu0 %v283_v0  ;;  %v280_v5 = vld [vmem:[%s2409_s17 + $0x20] sm:$0xff]  ;;  %v279_v6 = vld [vmem:[%s2409_s17 + $0x18] sm:$0xff] }
  0x57   : > { %1849 = vmatprep.subr.mxu1 %v283_v0  ;;  %304 = vperm.xlu1 %1980, %v290_v1   ;;  %v291_v7 = vld [vmem:[%s2893_s4 + $0x18] sm:$0xff]  ;;  %v278_v8 = vld [vmem:[%s2409_s17 + $0x10] sm:$0xff]  ;;  %v277_v9 = vld [vmem:[%s2409_s17 + $0x8] sm:$0xff] }
  0x58   : > { %350 = vmatpush1.msra.mxu0 %v282_v2  ;;  %1853 = vmatpush1.msra.mxu1 %v282_v2  ;;  %v276_v10 = vld [vmem:[%s2409_s17] sm:$0xff]  ;;  %v286_v14 = vld [vmem:[#allocation7 + $0x10] sm:$0xff]  ;;  %v289_v15 = vld [vmem:[%s2893_s4 + $0x8] sm:$0xff] }
  0x59   : > { %351 = vmatprep.subr.mxu0 %v281_v4  ;;  %1850 = vmatprep.subr.mxu1 %v281_v4  ;;  %v288_v12 = vld [vmem:[%s2893_s4] sm:$0xff]  ;;  %v285_v16 = vld [vmem:[#allocation7 + $0x8] sm:$0xff]  ;;  %v287_v17 = vld [vmem:[#allocation7 + $0x18] sm:$0xff] }
  0x5a   : > { %352 = vmatpush1.msra.mxu0 %v280_v5  ;;  %1854 = vmatpush1.msra.mxu1 %v280_v5  ;;  %v284_v13 = vld [vmem:[#allocation7] sm:$0xff] }
  0x5b   : > { %353 = vmatprep.subr.mxu0 %v279_v6  ;;  %1851 = vmatprep.subr.mxu1 %v279_v6 }
  0x5c   : > { %309 = vperm.xlu1 %1980, %v291_v7   ;;  %354 = vmatpush1.msra.mxu0 %v278_v8 }
  0x5d   : > { %1855 = vmatpush1.msra.mxu1 %v278_v8  ;;  %355 = vmatprep.subr.mxu0 %v277_v9 }
  0x5e   : > { %1852 = vmatprep.subr.mxu1 %v277_v9  ;;  %389 = vmatprep.mubr.f32.mxu0 %v2234_v11 }
  0x5f   : > { %401 = vmatprep.mubr.f32.mxu1 %v2234_v11  ;;  %1979 = vset.pattern.permute.xlu0 %v2233_v3 }
  0x60   : > { %356 = vmatpush1.msra.mxu0 %v276_v10  ;;  %1856 = vmatpush1.msra.mxu1 %v276_v10 }
  0x61   : > { %294 = vperm.xlu0 %1979, %v288_v12   ;;  %1549 = vmatmul.mubr.msk.f32.vlgmr.msra.gmra.mxu0 %vm312_vm0, %v284_v13 }
  0x62   : > { %1551 = vmatmul.mubr.msk.f32.vlgmr.msra.gmra.mxu1 %vm312_vm0, %v286_v14  ;;  %395 = vmatprep.mubr.f32.mxu0 %v2234_v11 }
  0x63   : > { %407 = vmatprep.mubr.f32.mxu1 %v2234_v11 }
  0x65   : > { %299 = vperm.xlu0 %1979, %v289_v15   ;;  %1550 = vmatmul.mubr.msk.f32.gmra.mxu0 %vm312_vm0, %v285_v16 }
  0x66   : > { %1552 = vmatmul.mubr.msk.f32.gmra.mxu1 %vm312_vm0, %v287_v17 }
  0x83   : > { %430 = vxpose.xlu0.b32.start [1/4] (short) %v276_v10, 128 }
  0x85   : > { %462 = vxpose.xlu1.b32.start [1/4] (short) %v277_v9, 128 }
  0x87   : > { %431 = vxpose.xlu0.b32.cont [2/4] (short) %v278_v8, 128 }
  0x89   : > { %463 = vxpose.xlu1.b32.cont [2/4] (short) %v279_v6, 128 }
  0x8b   : > { %432 = vxpose.xlu0.b32.cont [3/4] (short) %v280_v5, 128 }
  0x8d   : > { %464 = vxpose.xlu1.b32.cont [3/4] (short) %v281_v4, 128 }
  0x8f   : > { %433 = vxpose.xlu0.b32.end [4/4] (short) %v282_v2, 128 }
  0x91   : > { %465 = vxpose.xlu1.b32.end [4/4] (short) %v283_v0, 128 }
  0xd2   : > { %v305_v19 = vpop.permute.xlu1 %304 }
  0xd7   : > { %v2449_v21 = vpop.permute.xlu1 %309 }
  0xdc   : > { %v295_v18 = vpop.permute.xlu0 %294 }
  0xe0   : > { %v300_v20 = vpop.permute.xlu0 %299 }
  0xff   : > { %v446_v22 = vpop.trf.xlu0 }
 0x100   : > { %494 = vst.msk [vmem:[#allocation3] sm:$0xff] %vm312_vm0, %v446_v22 }
 0x101   : > { %v478_v23 = vpop.trf.xlu1 }
 0x102   : > { %510 = vst.msk [vmem:[#allocation3 + $0x80] sm:$0xff] %vm312_vm0, %v478_v23 }
 0x103   : > { %v447_v24 = vpop.trf.xlu0 }
 0x104   : > { %495 = vst.msk [vmem:[#allocation3 + $0x8] sm:$0xff] %vm312_vm0, %v447_v24 }
 0x105   : > { %v479_v25 = vpop.trf.xlu1 }
 0x106   : > { %511 = vst.msk [vmem:[#allocation3 + $0x88] sm:$0xff] %vm312_vm0, %v479_v25 }
 0x107   : > { %v448_v26 = vpop.trf.xlu0 }
 0x108   : > { %496 = vst.msk [vmem:[#allocation3 + $0x10] sm:$0xff] %vm312_vm0, %v448_v26 }
 0x109   : > { %v480_v27 = vpop.trf.xlu1 }
 0x10a   : > { %512 = vst.msk [vmem:[#allocation3 + $0x90] sm:$0xff] %vm312_vm0, %v480_v27 }
 0x10b   : > { %v449_v28 = vpop.trf.xlu0 }
 0x10c   : > { %497 = vst.msk [vmem:[#allocation3 + $0x18] sm:$0xff] %vm312_vm0, %v449_v28 }
 0x10d   : > { %v481_v29 = vpop.trf.xlu1 }
 0x10e   : > { %513 = vst.msk [vmem:[#allocation3 + $0x98] sm:$0xff] %vm312_vm0, %v481_v29 }
 0x10f   : > { %v450_v30 = vpop.trf.xlu0 }
 0x110   : > { %498 = vst.msk [vmem:[#allocation3 + $0x20] sm:$0xff] %vm312_vm0, %v450_v30 }
 0x111   : > { %v482_v31 = vpop.trf.xlu1 }
 0x112   : > { %514 = vst.msk [vmem:[#allocation3 + $0xa0] sm:$0xff] %vm312_vm0, %v482_v31 }
 0x113   : > { %v451_v32 = vpop.trf.xlu0 }
 0x114   : > { %499 = vst.msk [vmem:[#allocation3 + $0x28] sm:$0xff] %vm312_vm0, %v451_v32 }
 0x115   : > { %v483_v33 = vpop.trf.xlu1 }
 0x116   : > { %515 = vst.msk [vmem:[#allocation3 + $0xa8] sm:$0xff] %vm312_vm0, %v483_v33 }
 0x117   : > { %v452_v34 = vpop.trf.xlu0 }
 0x118   : > { %500 = vst.msk [vmem:[#allocation3 + $0x30] sm:$0xff] %vm312_vm0, %v452_v34 }
 0x119   : > { %v484_v35 = vpop.trf.xlu1 }
 0x11a   : > { %516 = vst.msk [vmem:[#allocation3 + $0xb0] sm:$0xff] %vm312_vm0, %v484_v35 }
 0x11b   : > { %v453_v36 = vpop.trf.xlu0 }
 0x11c   : > { %501 = vst.msk [vmem:[#allocation3 + $0x38] sm:$0xff] %vm312_vm0, %v453_v36 }
 0x11d   : > { %v485_v37 = vpop.trf.xlu1 }
 0x11e   : > { %517 = vst.msk [vmem:[#allocation3 + $0xb8] sm:$0xff] %vm312_vm0, %v485_v37 }
 0x11f   : > { %v454_v38 = vpop.trf.xlu0 }
 0x120   : > { %502 = vst.msk [vmem:[#allocation3 + $0x40] sm:$0xff] %vm312_vm0, %v454_v38 }
 0x121   : > { %v391_v39 = vpop.f32.mrf.mxu0  ;;  %v486_v40 = vpop.trf.xlu1 }
 0x122   : > { %v392_v41 = vadd.f32 %v391_v39, %v295_v18  ;;  %v403_v42 = vpop.f32.mrf.mxu1  ;;  %518 = vst.msk [vmem:[#allocation3 + $0xc0] sm:$0xff] %vm312_vm0, %v486_v40 }
 0x123   : > { %v404_v43 = vadd.f32 %v403_v42, %v305_v19  ;;  %v393_v44 = vpop.f32.mrf.mxu0  ;;  %v455_v45 = vpop.trf.xlu0 }
 0x124   : > { %414 = vst [vmem:[#allocation2 + $0x30] sm:$0xff] %v392_v41  ;;  %v394_v46 = vadd.f32 %v393_v44, %v295_v18  ;;  %v405_v47 = vpop.f32.mrf.mxu1  ;;  %503 = vst.msk [vmem:[#allocation3 + $0x48] sm:$0xff] %vm312_vm0, %v455_v45 }
 0x125   : > { %418 = vst [vmem:[#allocation2 + $0x8] sm:$0xff] %v404_v43  ;;  %v406_v48 = vadd.f32 %v405_v47, %v305_v19  ;;  %v397_v49 = vpop.f32.mrf.mxu0  ;;  %v487_v50 = vpop.trf.xlu1 }
 0x126   : > { %415 = vst [vmem:[#allocation2] sm:$0xff] %v394_v46  ;;  %v398_v51 = vadd.f32 %v397_v49, %v300_v20  ;;  %v409_v52 = vpop.f32.mrf.mxu1  ;;  %519 = vst.msk [vmem:[#allocation3 + $0xc8] sm:$0xff] %vm312_vm0, %v487_v50 }
 0x127   : > { %419 = vst [vmem:[#allocation2 + $0x20] sm:$0xff] %v406_v48  ;;  %v410_v53 = vadd.f32 %v409_v52, %v2449_v21  ;;  %v399_v54 = vpop.f32.mrf.mxu0  ;;  %v456_v55 = vpop.trf.xlu0 }
 0x128   : > { %416 = vst [vmem:[#allocation2 + $0x18] sm:$0xff] %v398_v51  ;;  %v400_v56 = vadd.f32 %v399_v54, %v300_v20  ;;  %v411_v57 = vpop.f32.mrf.mxu1  ;;  %504 = vst.msk [vmem:[#allocation3 + $0x50] sm:$0xff] %vm312_vm0, %v456_v55 }
 0x129   : > { %420 = vst [vmem:[#allocation2 + $0x28] sm:$0xff] %v410_v53  ;;  %v412_v58 = vadd.f32 %v411_v57, %v2449_v21  ;;  %v488_v59 = vpop.trf.xlu1 }
 0x12a   : > { %417 = vst [vmem:[#allocation2 + $0x10] sm:$0xff] %v400_v56  ;;  %520 = vst.msk [vmem:[#allocation3 + $0xd0] sm:$0xff] %vm312_vm0, %v488_v59 }
 0x12b   : > { %421 = vst [vmem:[#allocation2 + $0x38] sm:$0xff] %v412_v58  ;;  %v457_v60 = vpop.trf.xlu0 }
 0x12c   : > { %505 = vst.msk [vmem:[#allocation3 + $0x58] sm:$0xff] %vm312_vm0, %v457_v60 }
 0x12d   : > { %v489_v61 = vpop.trf.xlu1 }
 0x12e   : > { %521 = vst.msk [vmem:[#allocation3 + $0xd8] sm:$0xff] %vm312_vm0, %v489_v61 }
 0x12f   : > { %v458_v62 = vpop.trf.xlu0 }
 0x130   : > { %506 = vst.msk [vmem:[#allocation3 + $0x60] sm:$0xff] %vm312_vm0, %v458_v62 }
 0x131   : > { %v490_v63 = vpop.trf.xlu1 }
 0x132   : > { %522 = vst.msk [vmem:[#allocation3 + $0xe0] sm:$0xff] %vm312_vm0, %v490_v63 }
 0x133   : > { %v459_v0 = vpop.trf.xlu0 }
 0x134   : > { %507 = vst.msk [vmem:[#allocation3 + $0x68] sm:$0xff] %vm312_vm0, %v459_v0 }
 0x135   : > { %v491_v1 = vpop.trf.xlu1 }
 0x136   : > { %523 = vst.msk [vmem:[#allocation3 + $0xe8] sm:$0xff] %vm312_vm0, %v491_v1 }
 0x137   : > { %v460_v2 = vpop.trf.xlu0 }
 0x138   : > { %508 = vst.msk [vmem:[#allocation3 + $0x70] sm:$0xff] %vm312_vm0, %v460_v2 }
 0x139   : > { %v492_v3 = vpop.trf.xlu1 }
 0x13a   : > { %524 = vst.msk [vmem:[#allocation3 + $0xf0] sm:$0xff] %vm312_vm0, %v492_v3 }
 0x13b   : > { %v461_v4 = vpop.trf.xlu0 }
 0x13c   : > { %509 = vst.msk [vmem:[#allocation3 + $0x78] sm:$0xff] %vm312_vm0, %v461_v4 }
 0x13d   : > { %v493_v5 = vpop.trf.xlu1 }
 0x13e   : > { %525 = vst.msk [vmem:[#allocation3 + $0xf8] sm:$0xff] %vm312_vm0, %v493_v5 }
 0x13f PF: > { %v547_v6 = vld [vmem:[%s2890_s1 + $0x18] sm:$0xff]  ;;  %v546_v7 = vld [vmem:[%s2890_s1 + $0x10] sm:$0xff]  ;;  %s1553_s15 = sshll.u32 %s2209_s24, 7  ;;  %vm555_vm1 = vcmask 261120   ;;  %v545_v8 = vld [vmem:[%s2890_s1 + $0x8] sm:$0xff]  ;;  %s2922_s14 = sld [smem:[#allocation14_spill]] }
 0x140   : > { %1737 = vmatprep.subr.mxu0 %v547_v6  ;;  %s2495_s25 = scalar_lea.vmem [#allocation3], %s1553_s15  ;;  %v544_v10 = vld [vmem:[%s2890_s1] sm:$0xff]  ;;  %v750_v60 = vld [vmem:[#allocation3 + $0x8] sm:$0xff]  ;;  %v751_v61 = vld [vmem:[#allocation3 + $0x10] sm:$0xff]  ;;  %s2923_s18 = sld [smem:[#allocation16_spill]] }
 0x141   : > { %1738 = vmatpush3.msra.mxu0 %v547_v6  ;;  %v749_v26 = vld [vmem:[#allocation3] sm:$0xff]  ;;  %v752_v62 = vld [vmem:[#allocation3 + $0x18] sm:$0xff]  ;;  %v754_v0 = vld [vmem:[#allocation3 + $0x28] sm:$0xff]  ;;  %s1438_s9 = sshll.u32 %s2422_s11, 4  ;;  %s2924_s15 = sld [smem:[#allocation21_spill]]  ;;  %s2824_s9 = int_to_ptr.vmem [resolvable:$true] %s1438_s9 }
 0x142   : > { %1739 = vmatprep.subr.mxu0 %v546_v7  ;;  %1801 = vmatprep.mubr.msk.f32.mxu1 %vm555_vm1, %v749_v26  ;;  %v1554_v41 = vld [vmem:[%s2891_s2] ss:$0 sm:$0xff]  ;;  %v755_v1 = vld [vmem:[#allocation3 + $0x30] sm:$0xff]  ;;  %v756_v2 = vld [vmem:[#allocation3 + $0x38] sm:$0xff]  ;;  %s2101_s17 = scalar_lea.vmem %s2824_s9, 512 }
 0x143   : > { %1740 = vmatpush3.msra.mxu0 %v546_v7  ;;  %v753_v63 = vld [vmem:[#allocation3 + $0x20] sm:$0xff]  ;;  %v758_v4 = vld [vmem:[#allocation3 + $0x48] sm:$0xff]  ;;  %v759_v5 = vld [vmem:[#allocation3 + $0x50] sm:$0xff]  ;;  %p2102_p1 = scmp.ne.s32.totalorder %s2824_s9, %s2101_s17 }
 0x144   : > { %1741 = vmatprep.subr.mxu0 %v545_v8  ;;  %v757_v3 = vld [vmem:[#allocation3 + $0x40] sm:$0xff]  ;;  %v760_v6 = vld [vmem:[#allocation3 + $0x58] sm:$0xff] }
 0x145   : > { %v528_v9 = vld [vmem:[%s2495_s25] sm:$0xff]  ;;  %1742 = vmatpush3.msra.mxu0 %v545_v8  ;;  %v529_v11 = vld [vmem:[%s2495_s25 + $0x8] sm:$0xff]  ;;  %v530_v12 = vld [vmem:[%s2495_s25 + $0x10] sm:$0xff]  ;;  %s1620_s12 = sshll.u32 %s2922_s14, 3 }
 0x146   : > { %1745 = vmatprep.mubr.msk.f32.mxu0 %vm555_vm1, %v528_v9  ;;  %1743 = vmatprep.subr.mxu0 %v544_v10  ;;  %v531_v13 = vld [vmem:[%s2495_s25 + $0x18] sm:$0xff]  ;;  %v532_v14 = vld [vmem:[%s2495_s25 + $0x20] sm:$0xff]  ;;  %v533_v15 = vld [vmem:[%s2495_s25 + $0x28] sm:$0xff]  ;;  %s1435_s29 = sadd.s32 %s2209_s24, %s1620_s12  ;;  %s2829_s24 = scalar_lea.sflag [#allocation6], %s269_s5 }
 0x147   : > { %1744 = vmatpush3.msra.mxu0 %v544_v10  ;;  %v534_v16 = vld [vmem:[%s2495_s25 + $0x30] sm:$0xff]  ;;  %v535_v17 = vld [vmem:[%s2495_s25 + $0x38] sm:$0xff]  ;;  %v536_v18 = vld [vmem:[%s2495_s25 + $0x40] sm:$0xff]  ;;  %s1621_s7 = sshll.u32 %s1435_s29, 7  ;;  %p2925_p3 = scmp.ne.s32.totalorder %s2923_s18, 0 }
 0x148   : > { %1746 = vmatmul.mubr.msk.f32.vlgmr.msra.gmra.mxu0 %vm555_vm1, %v529_v11  ;;  %v537_v19 = vld [vmem:[%s2495_s25 + $0x48] sm:$0xff]  ;;  %v538_v20 = vld [vmem:[%s2495_s25 + $0x50] sm:$0xff]  ;;  %v539_v21 = vld [vmem:[%s2495_s25 + $0x58] sm:$0xff]  ;;  %s2822_s16 = scalar_lea.hbm %s2924_s15, %s1621_s7 }
 0x149   : > { %1748 = vmatprep.mubr.msk.f32.mxu0 %vm555_vm1, %v530_v12  ;;  %v540_v22 = vld [vmem:[%s2495_s25 + $0x60] sm:$0xff]  ;;  %v541_v23 = vld [vmem:[%s2495_s25 + $0x68] sm:$0xff]  ;;  %v542_v24 = vld [vmem:[%s2495_s25 + $0x70] sm:$0xff]  ;;  %p2103_p0 = pnand %p2102_p1, %p2925_p3 }
 0x14a   : > { %v543_v25 = vld [vmem:[%s2495_s25 + $0x78] sm:$0xff]  ;;  %v761_v7 = vld [vmem:[#allocation3 + $0x60] sm:$0xff]  ;;  %v762_v8 = vld [vmem:[#allocation3 + $0x68] sm:$0xff]  ;;  %s2235_s25 = smov [#allocation9]  }
 0x14b   : > { %v763_v9 = vld [vmem:[#allocation3 + $0x70] sm:$0xff]  ;;  %v764_v10 = vld [vmem:[#allocation3 + $0x78] sm:$0xff]  ;;  %v765_v11 = vld [vmem:[#allocation3 + $0x80] sm:$0xff]  ;;  %p2104_p13 = pneg %p2103_p0  ;;  %s2105_s8 = sshll.u32 %s2235_s25, 4  ;;  %s2106_s8 = int_to_ptr.vmem [resolvable:$false] %s2105_s8 }
 0x14c   : > { %1749 = vmatmul.mubr.msk.f32.gmra.mxu0 %vm555_vm1, %v531_v13  ;;  %v766_v12 = vld [vmem:[#allocation3 + $0x88] sm:$0xff]  ;;  %v767_v13 = vld [vmem:[#allocation3 + $0x90] sm:$0xff]  ;;  %v780_v26 = vld [vmem:[#allocation3 + $0xf8] sm:$0xff]  ;;  %s2107_s30 = scalar_lea.vmem %s2106_s8, 1024  ;;  %p2108_p5 = scmp.lt.s32.totalorder %s2824_s9, %s2106_s8 }
 0x14d   : > { %1751 = vmatprep.mubr.msk.f32.mxu0 %vm555_vm1, %v532_v14  ;;  %v768_v14 = vld [vmem:[#allocation3 + $0x98] sm:$0xff]  ;;  %p2109_p6 = scmp.lt.s32.totalorder %s2107_s30, %s2101_s17 }
 0x14f   : > { %p2110_p8 = por %p2109_p6, %p2108_p5 }
 0x150   : > { %1752 = vmatmul.mubr.msk.f32.gmra.mxu0 %vm555_vm1, %v533_v15  ;;  %v769_v15 = vld [vmem:[#allocation3 + $0xa0] sm:$0xff] }
 0x151   : > { %1754 = vmatprep.mubr.msk.f32.mxu0 %vm555_vm1, %v534_v16  ;;  %v770_v16 = vld [vmem:[#allocation3 + $0xa8] sm:$0xff]  ;;  %p2111_p7 = pnand %p2110_p8, %p2104_p13 }
 0x154   : > { %1755 = vmatmul.mubr.msk.f32.gmra.mxu0 %vm555_vm1, %v535_v17  ;;  %v771_v17 = vld [vmem:[#allocation3 + $0xb0] sm:$0xff] }
 0x155   : > { %1757 = vmatprep.mubr.msk.f32.mxu0 %vm555_vm1, %v536_v18  ;;  %v772_v18 = vld [vmem:[#allocation3 + $0xb8] sm:$0xff] }
 0x158   : > { %1758 = vmatmul.mubr.msk.f32.gmra.mxu0 %vm555_vm1, %v537_v19  ;;  %v773_v19 = vld [vmem:[#allocation3 + $0xc0] sm:$0xff] }
 0x159   : > { %1760 = vmatprep.mubr.msk.f32.mxu0 %vm555_vm1, %v538_v20  ;;  %v774_v20 = vld [vmem:[#allocation3 + $0xc8] sm:$0xff] }
 0x15c   : > { %1761 = vmatmul.mubr.msk.f32.gmra.mxu0 %vm555_vm1, %v539_v21  ;;  %v775_v21 = vld [vmem:[#allocation3 + $0xd0] sm:$0xff] }
 0x15d   : > { %1763 = vmatprep.mubr.msk.f32.mxu0 %vm555_vm1, %v540_v22  ;;  %v776_v22 = vld [vmem:[#allocation3 + $0xd8] sm:$0xff] }
 0x160   : > { %1764 = vmatmul.mubr.msk.f32.gmra.mxu0 %vm555_vm1, %v541_v23  ;;  %v777_v23 = vld [vmem:[#allocation3 + $0xe0] sm:$0xff] }
 0x161   : > { %1766 = vmatprep.mubr.msk.f32.mxu0 %vm555_vm1, %v542_v24  ;;  %v778_v24 = vld [vmem:[#allocation3 + $0xe8] sm:$0xff] }
 0x164   : > { %1767 = vmatmul.mubr.msk.f32.gmra.mxu0 %vm555_vm1, %v543_v25  ;;  %v779_v25 = vld [vmem:[#allocation3 + $0xf0] sm:$0xff] }
 0x208   : > { %v1747_v27 = vpop.f32.mrf.mxu0 }
 0x209   : > { %v676_v58 = vadd.f32 %v1747_v27, %v1554_v41 }
 0x20a   : > { %v670_v28 = vpop.f32.mrf.mxu0 }
 0x20b   : > { %v671_v59 = vadd.f32 %v1554_v41, %v670_v28 }
 0x20c   : > { %v1750_v29 = vpop.f32.mrf.mxu0 }
 0x20d   : > { %v686_v56 = vadd.f32 %v1750_v29, %v1554_v41 }
 0x20e   : > { %v680_v30 = vpop.f32.mrf.mxu0 }
 0x20f   : > { %v681_v57 = vadd.f32 %v1554_v41, %v680_v30 }
 0x210   : > { %v1753_v31 = vpop.f32.mrf.mxu0 }
 0x211   : > { %v696_v54 = vadd.f32 %v1753_v31, %v1554_v41 }
 0x212   : > { %v690_v32 = vpop.f32.mrf.mxu0 }
 0x213   : > { %v691_v55 = vadd.f32 %v1554_v41, %v690_v32 }
 0x214   : > { %v1756_v33 = vpop.f32.mrf.mxu0 }
 0x215   : > { %v706_v52 = vadd.f32 %v1756_v33, %v1554_v41 }
 0x216   : > { %v700_v34 = vpop.f32.mrf.mxu0 }
 0x217   : > { %v701_v53 = vadd.f32 %v1554_v41, %v700_v34 }
 0x218   : > { %v1759_v35 = vpop.f32.mrf.mxu0 }
 0x219   : > { %v716_v50 = vadd.f32 %v1759_v35, %v1554_v41 }
 0x21a   : > { %v710_v36 = vpop.f32.mrf.mxu0 }
 0x21b   : > { %v711_v51 = vadd.f32 %v1554_v41, %v710_v36 }
 0x21c   : > { %v1762_v37 = vpop.f32.mrf.mxu0 }
 0x21d   : > { %v726_v48 = vadd.f32 %v1762_v37, %v1554_v41 }
 0x21e   : > { %v720_v38 = vpop.f32.mrf.mxu0 }
 0x21f   : > { %v721_v49 = vadd.f32 %v1554_v41, %v720_v38 }
 0x220   : > { %v1765_v39 = vpop.f32.mrf.mxu0 }
 0x221   : > { %v736_v46 = vadd.f32 %v1765_v39, %v1554_v41 }
 0x222   : > { %v730_v40 = vpop.f32.mrf.mxu0 }
 0x223   : > { %v731_v47 = vadd.f32 %v1554_v41, %v730_v40 }
 0x224   : > { %v1768_v42 = vpop.f32.mrf.mxu0 }
 0x225   : > { %v746_v43 = vadd.f32 %v1768_v42, %v1554_v41 }
 0x226   : > { %v740_v44 = vpop.f32.mrf.mxu0 }
 0x227   : > { %v741_v45 = vadd.f32 %v1554_v41, %v740_v44  ;;  %1769 = vmatprep.subr.msk.mxu1 %vm555_vm1, %v746_v43 }
 0x228   : > { %1770 = vmatpush3.xpose.msk.msra.mxu1 %vm555_vm1, %v746_v43 }
 0x229   : > { %1771 = vmatprep.subr.msk.mxu1 %vm555_vm1, %v741_v45 }
 0x22c   : > { %1772 = vmatpush3.xpose.msk.msra.mxu1 %vm555_vm1, %v741_v45 }
 0x22d   : > { %1773 = vmatprep.subr.msk.mxu1 %vm555_vm1, %v736_v46 }
 0x230   : > { %1774 = vmatpush3.xpose.msk.msra.mxu1 %vm555_vm1, %v736_v46 }
 0x231   : > { %1775 = vmatprep.subr.msk.mxu1 %vm555_vm1, %v731_v47 }
 0x234   : > { %1776 = vmatpush3.xpose.msk.msra.mxu1 %vm555_vm1, %v731_v47  ;;  %v1321_v47 = vld [vmem:[#allocation2] sm:$0xff] }
 0x235   : > { %1777 = vmatprep.subr.msk.mxu1 %vm555_vm1, %v726_v48  ;;  %1392 = vmatprep.mubr.f32.mxu0 %v1321_v47 }
 0x238   : > { %1778 = vmatpush3.xpose.msk.msra.mxu1 %vm555_vm1, %v726_v48 }
 0x239   : > { %1779 = vmatprep.subr.msk.mxu1 %vm555_vm1, %v721_v49 }
 0x23c   : > { %1780 = vmatpush3.xpose.msk.msra.mxu1 %vm555_vm1, %v721_v49 }
 0x23d   : > { %1781 = vmatprep.subr.msk.mxu1 %vm555_vm1, %v716_v50 }
 0x240   : > { %1782 = vmatpush3.xpose.msk.msra.mxu1 %vm555_vm1, %v716_v50 }
 0x241   : > { %1783 = vmatprep.subr.msk.mxu1 %vm555_vm1, %v711_v51 }
 0x244   : > { %1784 = vmatpush3.xpose.msk.msra.mxu1 %vm555_vm1, %v711_v51 }
 0x245   : > { %1785 = vmatprep.subr.msk.mxu1 %vm555_vm1, %v706_v52 }
 0x248   : > { %1786 = vmatpush3.xpose.msk.msra.mxu1 %vm555_vm1, %v706_v52 }
 0x249   : > { %1787 = vmatprep.subr.msk.mxu1 %vm555_vm1, %v701_v53 }
 0x24c   : > { %1788 = vmatpush3.xpose.msk.msra.mxu1 %vm555_vm1, %v701_v53 }
 0x24d   : > { %1789 = vmatprep.subr.msk.mxu1 %vm555_vm1, %v696_v54 }
 0x250   : > { %1790 = vmatpush3.xpose.msk.msra.mxu1 %vm555_vm1, %v696_v54 }
 0x251   : > { %1791 = vmatprep.subr.msk.mxu1 %vm555_vm1, %v691_v55 }
 0x254   : > { %1792 = vmatpush3.xpose.msk.msra.mxu1 %vm555_vm1, %v691_v55 }
 0x255   : > { %1793 = vmatprep.subr.msk.mxu1 %vm555_vm1, %v686_v56 }
 0x258   : > { %1794 = vmatpush3.xpose.msk.msra.mxu1 %vm555_vm1, %v686_v56 }
 0x259   : > { %1795 = vmatprep.subr.msk.mxu1 %vm555_vm1, %v681_v57 }
 0x25c   : > { %1796 = vmatpush3.xpose.msk.msra.mxu1 %vm555_vm1, %v681_v57 }
 0x25d   : > { %1797 = vmatprep.subr.msk.mxu1 %vm555_vm1, %v676_v58 }
 0x260   : > { %1798 = vmatpush3.xpose.msk.msra.mxu1 %vm555_vm1, %v676_v58 }
 0x261   : > { %1799 = vmatprep.subr.msk.mxu1 %vm555_vm1, %v671_v59 }
 0x264   : > { %1800 = vmatpush3.xpose.msk.msra.mxu1 %vm555_vm1, %v671_v59 }
 0x267   : > { %1802 = vmatmul.mubr.msk.f32.vlgmr.msra.gmra.mxu1 %vm555_vm1, %v750_v60 }
 0x268   : > { %1804 = vmatprep.mubr.msk.f32.mxu1 %vm555_vm1, %v751_v61 }
 0x26b   : > { %1805 = vmatmul.mubr.msk.f32.gmra.mxu1 %vm555_vm1, %v752_v62 }
 0x26c   : > { %1807 = vmatprep.mubr.msk.f32.mxu1 %vm555_vm1, %v753_v63 }
 0x26f   : > { %1808 = vmatmul.mubr.msk.f32.gmra.mxu1 %vm555_vm1, %v754_v0 }
 0x270   : > { %1810 = vmatprep.mubr.msk.f32.mxu1 %vm555_vm1, %v755_v1 }
 0x273   : > { %1811 = vmatmul.mubr.msk.f32.gmra.mxu1 %vm555_vm1, %v756_v2 }
 0x274   : > { %1813 = vmatprep.mubr.msk.f32.mxu1 %vm555_vm1, %v757_v3 }
 0x277   : > { %1814 = vmatmul.mubr.msk.f32.gmra.mxu1 %vm555_vm1, %v758_v4 }
 0x278   : > { %1816 = vmatprep.mubr.msk.f32.mxu1 %vm555_vm1, %v759_v5 }
 0x27b   : > { %1817 = vmatmul.mubr.msk.f32.gmra.mxu1 %vm555_vm1, %v760_v6 }
 0x27c   : > { %1819 = vmatprep.mubr.msk.f32.mxu1 %vm555_vm1, %v761_v7 }
 0x27f   : > { %1820 = vmatmul.mubr.msk.f32.gmra.mxu1 %vm555_vm1, %v762_v8 }
 0x280   : > { %1822 = vmatprep.mubr.msk.f32.mxu1 %vm555_vm1, %v763_v9 }
 0x283   : > { %1823 = vmatmul.mubr.msk.f32.gmra.mxu1 %vm555_vm1, %v764_v10 }
 0x284   : > { %1825 = vmatprep.mubr.msk.f32.mxu1 %vm555_vm1, %v765_v11 }
 0x287   : > { %1826 = vmatmul.mubr.msk.f32.gmra.mxu1 %vm555_vm1, %v766_v12 }
 0x288   : > { %1828 = vmatprep.mubr.msk.f32.mxu1 %vm555_vm1, %v767_v13 }
 0x28b   : > { %1829 = vmatmul.mubr.msk.f32.gmra.mxu1 %vm555_vm1, %v768_v14 }
 0x28c   : > { %1831 = vmatprep.mubr.msk.f32.mxu1 %vm555_vm1, %v769_v15 }
 0x28f   : > { %1832 = vmatmul.mubr.msk.f32.gmra.mxu1 %vm555_vm1, %v770_v16 }
 0x290   : > { %1834 = vmatprep.mubr.msk.f32.mxu1 %vm555_vm1, %v771_v17 }
 0x293   : > { %1835 = vmatmul.mubr.msk.f32.gmra.mxu1 %vm555_vm1, %v772_v18 }
 0x294   : > { %1837 = vmatprep.mubr.msk.f32.mxu1 %vm555_vm1, %v773_v19 }
 0x297   : > { %1838 = vmatmul.mubr.msk.f32.gmra.mxu1 %vm555_vm1, %v774_v20 }
 0x298   : > { %1840 = vmatprep.mubr.msk.f32.mxu1 %vm555_vm1, %v775_v21 }
 0x29b   : > { %1841 = vmatmul.mubr.msk.f32.gmra.mxu1 %vm555_vm1, %v776_v22 }
 0x29c   : > { %1843 = vmatprep.mubr.msk.f32.mxu1 %vm555_vm1, %v777_v23 }
 0x29f   : > { %1844 = vmatmul.mubr.msk.f32.gmra.mxu1 %vm555_vm1, %v778_v24 }
 0x2a0   : > { %1846 = vmatprep.mubr.msk.f32.mxu1 %vm555_vm1, %v779_v25 }
 0x2a3   : > { %1847 = vmatmul.mubr.msk.f32.gmra.mxu1 %vm555_vm1, %v780_v26 }
 0x327   : > { %v2599_v27 = vpop.f32.mrf.mxu1 }
 0x329   : > { %v2601_v28 = vpop.f32.mrf.mxu1 }
 0x32b   : > { %v2603_v29 = vpop.f32.mrf.mxu1 }
 0x32d   : > { %v2605_v30 = vpop.f32.mrf.mxu1 }
 0x32f   : > { %v2607_v31 = vpop.f32.mrf.mxu1 }
 0x330   : > { %v1151_v55 = vmax.f32 %v2599_v27, %v2607_v31 }
 0x331   : > { %v2609_v32 = vpop.f32.mrf.mxu1 }
 0x332   : > { %v1150_v53 = vmax.f32 %v2601_v28, %v2609_v32 }
 0x333   : > { %v2611_v33 = vpop.f32.mrf.mxu1 }
 0x334   : > { %v1153_v56 = vmax.f32 %v2603_v29, %v2611_v33 }
 0x335   : > { %v2613_v34 = vpop.f32.mrf.mxu1 }
 0x336   : > { %v1152_v57 = vmax.f32 %v2605_v30, %v2613_v34 }
 0x337   : > { %v2615_v35 = vpop.f32.mrf.mxu1 }
 0x338   : > { %v1155_v60 = vmax.f32 %v1151_v55, %v2615_v35 }
 0x339   : > { %v2617_v36 = vpop.f32.mrf.mxu1 }
 0x33a   : > { %v1154_v58 = vmax.f32 %v1150_v53, %v2617_v36 }
 0x33b   : > { %v2619_v37 = vpop.f32.mrf.mxu1 }
 0x33c   : > { %v1157_v61 = vmax.f32 %v1153_v56, %v2619_v37 }
 0x33d   : > { %v2621_v38 = vpop.f32.mrf.mxu1 }
 0x33e   : > { %v1156_v62 = vmax.f32 %v1152_v57, %v2621_v38 }
 0x33f   : > { %v2623_v39 = vpop.f32.mrf.mxu1 }
 0x340   : > { %v1159_v1 = vmax.f32 %v1155_v60, %v2623_v39 }
 0x341   : > { %v2625_v40 = vpop.f32.mrf.mxu1 }
 0x342   : > { %v1158_v63 = vmax.f32 %v1154_v58, %v2625_v40 }
 0x343   : > { %v2627_v41 = vpop.f32.mrf.mxu1 }
 0x344   : > { %v1161_v2 = vmax.f32 %v1157_v61, %v2627_v41 }
 0x345   : > { %v2629_v42 = vpop.f32.mrf.mxu1 }
 0x346   : > { %v1160_v3 = vmax.f32 %v1156_v62, %v2629_v42 }
 0x347   : > { %v2631_v43 = vpop.f32.mrf.mxu1 }
 0x348   : > { %v1163_v6 = vmax.f32 %v1159_v1, %v2631_v43 }
 0x349   : > { %v2633_v44 = vpop.f32.mrf.mxu1 }
 0x34a   : > { %v1162_v4 = vmax.f32 %v1158_v63, %v2633_v44 }
 0x34b   : > { %v2635_v45 = vpop.f32.mrf.mxu1 }
 0x34c   : > { %v1165_v7 = vmax.f32 %v1161_v2, %v2635_v45 }
 0x34d   : > { %v2637_v46 = vpop.f32.mrf.mxu1 }
 0x34e   : > { %v1164_v8 = vmax.f32 %v1160_v3, %v2637_v46 }
 0x34f   : > { %v2639_v48 = vpop.f32.mrf.mxu1 }
 0x350   : > { %v1167_v11 = vmax.f32 %v1163_v6, %v2639_v48 }
 0x351   : > { %v2641_v49 = vpop.f32.mrf.mxu1 }
 0x352   : > { %v1166_v9 = vmax.f32 %v1162_v4, %v2641_v49 }
 0x353   : > { %v2643_v50 = vpop.f32.mrf.mxu1 }
 0x354   : > { %v1169_v12 = vmax.f32 %v1165_v7, %v2643_v50 }
 0x355   : > { %v2645_v51 = vpop.f32.mrf.mxu1 }
 0x356   : > { %v1168_v13 = vmax.f32 %v1164_v8, %v2645_v51 }
 0x357   : > { %v2647_v52 = vpop.f32.mrf.mxu1 }
 0x358   : > { %v1171_v16 = vmax.f32 %v1167_v11, %v2647_v52 }
 0x359   : > { %v2651_v54 = vpop.f32.mrf.mxu1 }
 0x35a   : > { %v1170_v14 = vmax.f32 %v1166_v9, %v2651_v54 }
 0x35b   : > { %v2660_v59 = vpop.f32.mrf.mxu1 }
 0x35c   : > { %v1173_v17 = vmax.f32 %v1169_v12, %v2660_v59 }
 0x35d   : > { %v2666_v0 = vpop.f32.mrf.mxu1 }
 0x35e   : > { %v1172_v18 = vmax.f32 %v1168_v13, %v2666_v0 }
 0x35f   : > { %v2672_v5 = vpop.f32.mrf.mxu1 }
 0x360   : > { %v1175_v21 = vmax.f32 %v1171_v16, %v2672_v5 }
 0x361   : > { %v2678_v10 = vpop.f32.mrf.mxu1 }
 0x362   : > { %v1174_v19 = vmax.f32 %v1170_v14, %v2678_v10 }
 0x363   : > { %v2684_v15 = vpop.f32.mrf.mxu1 }
 0x364   : > { %v1177_v22 = vmax.f32 %v1173_v17, %v2684_v15  ;;  %v1178_v24 = vmax.f32 %v1174_v19, %v1175_v21 }
 0x365   : > { %v2690_v20 = vpop.f32.mrf.mxu1 }
 0x366   : > { %v1176_v23 = vmax.f32 %v1172_v18, %v2690_v20 }
 0x368   : > { %v1179_v25 = vmax.f32 %v1176_v23, %v1177_v22 }
 0x36a   : > { %v1180_v26 = vmax.f32 %v1178_v24, %v1179_v25 }
 0x36c   : > { %v1181_v47 = vrot.slane %v1180_v26, 4 }
 0x36e   : > { %v1182_v53 = vmax.f32 %v1180_v26, %v1181_v47 }
 0x370   : > { %v1183_v55 = vrot.slane %v1182_v53, 2 }
 0x372   : > { %v1184_v56 = vmax.f32 %v1182_v53, %v1183_v55 }
 0x374   : > { %v1185_v57 = vrot.slane %v1184_v56, 1 }
 0x376   : > { %v2695_v58 = vmax.f32 %v1184_v56, %v1185_v57 }
 0x378   : > { %v1187_v60 = vsub.f32 %v2601_v28, %v2695_v58  ;;  %v1188_v61 = vsub.f32 %v2599_v27, %v2695_v58  ;;  %v1189_v62 = vsub.f32 %v2605_v30, %v2695_v58  ;;  %v1190_v63 = vsub.f32 %v2603_v29, %v2695_v58 }
 0x379   : > { %v1191_v3 = vsub.f32 %v2609_v32, %v2695_v58  ;;  %v1192_v6 = vsub.f32 %v2607_v31, %v2695_v58  ;;  %v1193_v27 = vsub.f32 %v2613_v34, %v2695_v58  ;;  %v1194_v29 = vsub.f32 %v2611_v33, %v2695_v58 }
 0x37a   : > { %v1219_v1 = vmul.f32 1.442695, %v1187_v60  ;;  %v1221_v2 = vmul.f32 1.442695, %v1188_v61  ;;  %v1223_v4 = vmul.f32 1.442695, %v1189_v62  ;;  %v1195_v32 = vsub.f32 %v2617_v36, %v2695_v58 }
 0x37b   : > { %v1225_v28 = vmul.f32 1.442695, %v1190_v63  ;;  %v1227_v30 = vmul.f32 1.442695, %v1191_v3  ;;  %v1229_v7 = vmul.f32 1.442695, %v1192_v6  ;;  %v1196_v31 = vsub.f32 %v2615_v35, %v2695_v58 }
 0x37c   : > { %1981 = vpow2.f32 %v1219_v1  ;;  %v1231_v8 = vmul.f32 1.442695, %v1193_v27  ;;  %v1233_v9 = vmul.f32 1.442695, %v1194_v29  ;;  %v1197_v34 = vsub.f32 %v2621_v38, %v2695_v58 }
 0x37d   : > { %1983 = vpow2.f32 %v1221_v2  ;;  %v1235_v11 = vmul.f32 1.442695, %v1195_v32  ;;  %v1198_v33 = vsub.f32 %v2619_v37, %v2695_v58  ;;  %v1237_v13 = vmul.f32 1.442695, %v1196_v31 }
 0x37e   : > { %1985 = vpow2.f32 %v1223_v4  ;;  %v1199_v14 = vsub.f32 %v2625_v40, %v2695_v58  ;;  %v1239_v35 = vmul.f32 1.442695, %v1197_v34  ;;  %v1200_v17 = vsub.f32 %v2623_v39, %v2695_v58 }
 0x37f   : > { %1987 = vpow2.f32 %v1225_v28  ;;  %v1241_v18 = vmul.f32 1.442695, %v1198_v33  ;;  %v1201_v21 = vsub.f32 %v2629_v42, %v2695_v58  ;;  %v1202_v24 = vsub.f32 %v2627_v41, %v2695_v58 }
 0x380   : > { %1989 = vpow2.f32 %v1227_v30  ;;  %v1243_v40 = vmul.f32 1.442695, %v1199_v14  ;;  %v1245_v39 = vmul.f32 1.442695, %v1200_v17  ;;  %v1203_v47 = vsub.f32 %v2633_v44, %v2695_v58 }
 0x381   : > { %1991 = vpow2.f32 %v1229_v7  ;;  %v1218_v42 = vsub.f32 %v2684_v15, %v2695_v58  ;;  %v1247_v53 = vmul.f32 1.442695, %v1201_v21  ;;  %v1204_v41 = vsub.f32 %v2631_v43, %v2695_v58 }
 0x382   : > { %1993 = vpow2.f32 %v1231_v8  ;;  %v1217_v57 = vsub.f32 %v2690_v20, %v2695_v58  ;;  %v1249_v60 = vmul.f32 1.442695, %v1202_v24  ;;  %v1205_v15 = vsub.f32 %v2637_v46, %v2695_v58 }
 0x383   : > { %1995 = vpow2.f32 %v1233_v9  ;;  %v1251_v62 = vmul.f32 1.442695, %v1203_v47  ;;  %v1216_v63 = vsub.f32 %v2672_v5, %v2695_v58  ;;  %v1281_v1 = vmul.f32 1.442695, %v1218_v42 }
 0x384   : > { %1997 = vpow2.f32 %v1235_v11  ;;  %v1206_v20 = vsub.f32 %v2635_v45, %v2695_v58  ;;  %v1253_v3 = vmul.f32 1.442695, %v1204_v41  ;;  %v1215_v4 = vsub.f32 %v2678_v10, %v2695_v58 }
 0x385   : > { %1999 = vpow2.f32 %v1237_v13  ;;  %v1279_v6 = vmul.f32 1.442695, %v1217_v57  ;;  %v1207_v5 = vsub.f32 %v2641_v49, %v2695_v58  ;;  %v1255_v27 = vmul.f32 1.442695, %v1205_v15 }
 0x386   : > { %2001 = vpow2.f32 %v1239_v35  ;;  %v1214_v30 = vsub.f32 %v2660_v59, %v2695_v58  ;;  %v1277_v29 = vmul.f32 1.442695, %v1216_v63  ;;  %v1208_v10 = vsub.f32 %v2639_v48, %v2695_v58 }
 0x387   : > { %2003 = vpow2.f32 %v1241_v18  ;;  %v1257_v32 = vmul.f32 1.442695, %v1206_v20  ;;  %v1213_v8 = vsub.f32 %v2666_v0, %v2695_v58  ;;  %v1275_v49 = vmul.f32 1.442695, %v1215_v4 }
 0x388   : > { %2005 = vpow2.f32 %v1243_v40  ;;  %v1209_v59 = vsub.f32 %v2645_v51, %v2695_v58  ;;  %v1259_v34 = vmul.f32 1.442695, %v1207_v5  ;;  %v1212_v11 = vsub.f32 %v2647_v52, %v2695_v58 }
 0x389   : > { %v2719_v12 = vpop.eup %1981  ;;  %2007 = vpow2.f32 %v1245_v39  ;;  %v1273_v33 = vmul.f32 1.442695, %v1214_v30  ;;  %v1210_v0 = vsub.f32 %v2643_v50, %v2695_v58  ;;  %v1261_v14 = vmul.f32 1.442695, %v1208_v10 }
 0x38a   : > { %v2723_v36 = vpop.eup %1983  ;;  %2009 = vpow2.f32 %v1247_v53  ;;  %v1211_v35 = vsub.f32 %v2651_v54, %v2695_v58  ;;  %v1263_v18 = vmul.f32 1.442695, %v1209_v59 }
 0x38b   : > { %v1283_v16 = vadd.f32 %v2723_v36, %v2719_v12  ;;  %v2729_v38 = vpop.eup %1985  ;;  %2011 = vpow2.f32 %v1249_v60  ;;  %v1265_v40 = vmul.f32 1.442695, %v1210_v0 }
 0x38c   : > { %v2734_v19 = vpop.eup %1987  ;;  %2013 = vpow2.f32 %v1251_v62 }
 0x38d   : > { %v1284_v37 = vadd.f32 %v2729_v38, %v1283_v16  ;;  %v2739_v23 = vpop.eup %1989  ;;  %2015 = vpow2.f32 %v1281_v1  ;;  %v1271_v16 = vmul.f32 1.442695, %v1213_v8  ;;  %v1324_v8 = vld [vmem:[#allocation2 + $0x8] sm:$0xff] }
 0x38e   : > { %v2744_v26 = vpop.eup %1991  ;;  %2017 = vpow2.f32 %v1253_v3 }
 0x38f   : > { %v1285_v22 = vadd.f32 %v2734_v19, %v1284_v37  ;;  %v2751_v56 = vpop.eup %1993  ;;  %2019 = vpow2.f32 %v1279_v6  ;;  %v1269_v37 = vmul.f32 1.442695, %v1212_v11 }
 0x390   : > { %v2758_v44 = vpop.eup %1995  ;;  %2021 = vpow2.f32 %v1255_v27 }
 0x391   : > { %v1286_v25 = vadd.f32 %v2739_v23, %v1285_v22  ;;  %v2765_v2 = vpop.eup %1997  ;;  %2023 = vpow2.f32 %v1277_v29  ;;  %v1267_v22 = vmul.f32 1.442695, %v1211_v35 }
 0x392   : > { %v2772_v28 = vpop.eup %1999  ;;  %2025 = vpow2.f32 %v1257_v32 }
 0x393   : > { %v1287_v55 = vadd.f32 %v2744_v26, %v1286_v25  ;;  %v2779_v7 = vpop.eup %2001  ;;  %2027 = vpow2.f32 %v1275_v49  ;;  %v1326_v49 = vld [vmem:[#allocation2 + $0x28] sm:$0xff] }
 0x394   : > { %v2004_v9 = vpop.eup %2003  ;;  %2029 = vpow2.f32 %v1259_v34 }
 0x395   : > { %v1288_v61 = vadd.f32 %v2751_v56, %v1287_v55  ;;  %v2006_v13 = vpop.eup %2005  ;;  %2031 = vpow2.f32 %v1273_v33 }
 0x396   : > { %v2008_v17 = vpop.eup %2007  ;;  %2033 = vpow2.f32 %v1261_v14 }
 0x397   : > { %v1289_v43 = vadd.f32 %v2758_v44, %v1288_v61  ;;  %v2010_v21 = vpop.eup %2009  ;;  %2035 = vpow2.f32 %v1271_v16 }
 0x398   : > { %v2012_v24 = vpop.eup %2011  ;;  %2037 = vpow2.f32 %v1263_v18 }
 0x399   : > { %v1290_v46 = vadd.f32 %v2765_v2, %v1289_v43  ;;  %v2794_v39 = vpop.eup %2013  ;;  %2039 = vpow2.f32 %v1269_v37 }
 0x39a   : > { %v2796_v58 = vpop.eup %2015  ;;  %2041 = vpow2.f32 %v1265_v40 }
 0x39b   : > { %v1291_v45 = vadd.f32 %v2772_v28, %v1290_v46  ;;  %v2018_v25 = vpop.eup %2017  ;;  %2043 = vpow2.f32 %v1267_v22  ;;  %1693 = vmatprep.subr.mxu0 %v2796_v58 }
 0x39c   : > { %v2020_v42 = vpop.eup %2019  ;;  %1694 = vmatpush3.msra.mxu0 %v2012_v24 }
 0x39d   : > { %v1292_v31 = vadd.f32 %v2779_v7, %v1291_v45  ;;  %v2022_v53 = vpop.eup %2021  ;;  %1695 = vmatprep.subr.mxu0 %v2020_v42 }
 0x39e   : > { %v2024_v41 = vpop.eup %2023  ;;  %1696 = vmatpush3.msra.mxu0 %v2010_v21 }
 0x39f   : > { %v1293_v48 = vadd.f32 %v2004_v9, %v1292_v31  ;;  %v2026_v57 = vpop.eup %2025  ;;  %1697 = vmatprep.subr.mxu0 %v2024_v41 }
 0x3a0   : > { %v2028_v61 = vpop.eup %2027  ;;  %1698 = vmatpush3.msra.mxu0 %v2008_v17 }
 0x3a1   : > { %v1294_v51 = vadd.f32 %v2006_v13, %v1293_v48  ;;  %v2030_v15 = vpop.eup %2029  ;;  %1699 = vmatprep.subr.mxu0 %v2028_v61 }
 0x3a2   : > { %v2032_v63 = vpop.eup %2031  ;;  %1700 = vmatpush3.msra.mxu0 %v2006_v13 }
 0x3a3   : > { %v1295_v52 = vadd.f32 %v2008_v17, %v1294_v51  ;;  %v2034_v1 = vpop.eup %2033  ;;  %1701 = vmatprep.subr.mxu0 %v2032_v63 }
 0x3a4   : > { %v2036_v20 = vpop.eup %2035  ;;  %1702 = vmatpush3.msra.mxu0 %v2004_v9 }
 0x3a5   : > { %v1296_v50 = vadd.f32 %v2010_v21, %v1295_v52  ;;  %v2038_v3 = vpop.eup %2037  ;;  %1703 = vmatprep.subr.mxu0 %v2036_v20 }
 0x3a6   : > { %v2040_v6 = vpop.eup %2039  ;;  %1704 = vmatpush3.msra.mxu0 %v2779_v7 }
 0x3a7   : > { %v1297_v54 = vadd.f32 %v2012_v24, %v1296_v50  ;;  %v2042_v46 = vpop.eup %2041  ;;  %1705 = vmatprep.subr.mxu0 %v2040_v6 }
 0x3a8   : > { %v2044_v27 = vpop.eup %2043  ;;  %1706 = vmatpush3.msra.mxu0 %v2772_v28 }
 0x3a9   : > { %v1298_v47 = vadd.f32 %v2794_v39, %v1297_v54  ;;  %1707 = vmatprep.subr.mxu0 %v2044_v27 }
 0x3aa   : > { %1708 = vmatpush3.msra.mxu0 %v2765_v2 }
 0x3ab   : > { %v1299_v55 = vadd.f32 %v2018_v25, %v1298_v47  ;;  %1709 = vmatprep.subr.mxu0 %v2042_v46 }
 0x3ac   : > { %1710 = vmatpush3.msra.mxu0 %v2758_v44 }
 0x3ad   : > { %v1300_v60 = vadd.f32 %v2022_v53, %v1299_v55  ;;  %1711 = vmatprep.subr.mxu0 %v2038_v3 }
 0x3ae   : > { %1712 = vmatpush3.msra.mxu0 %v2751_v56  ;;  %v1320_v56 = vld [vmem:[#allocation2 + $0x30] sm:$0xff] }
 0x3af   : > { %v1301_v62 = vadd.f32 %v2026_v57, %v1300_v60  ;;  %1713 = vmatprep.subr.mxu0 %v2034_v1 }
 0x3b0   : > { %1714 = vmatpush3.msra.mxu0 %v2744_v26  ;;  %v1323_v26 = vld [vmem:[#allocation2 + $0x10] sm:$0xff] }
 0x3b1   : > { %v1302_v43 = vadd.f32 %v2030_v15, %v1301_v62  ;;  %1715 = vmatprep.subr.mxu0 %v2030_v15 }
 0x3b2   : > { %1716 = vmatpush3.msra.mxu0 %v2739_v23  ;;  %v1322_v23 = vld [vmem:[#allocation2 + $0x18] sm:$0xff] }
 0x3b3   : > { %v1303_v4 = vadd.f32 %v2034_v1, %v1302_v43  ;;  %1717 = vmatprep.subr.mxu0 %v2026_v57 }
 0x3b4   : > { %1718 = vmatpush3.msra.mxu0 %v2734_v19  ;;  %v1325_v19 = vld [vmem:[#allocation2 + $0x20] sm:$0xff] }
 0x3b5   : > { %v1304_v5 = vadd.f32 %v2038_v3, %v1303_v4  ;;  %1719 = vmatprep.subr.mxu0 %v2022_v53 }
 0x3b6   : > { %1720 = vmatpush3.msra.mxu0 %v2729_v38  ;;  %v1327_v38 = vld [vmem:[#allocation2 + $0x38] sm:$0xff] }
 0x3b7   : > { %v1305_v30 = vadd.f32 %v2042_v46, %v1304_v5  ;;  %1721 = vmatprep.subr.mxu0 %v2018_v25 }
 0x3b8   : > { %1722 = vmatpush3.msra.mxu0 %v2723_v36 }
 0x3b9   : > { %v1306_v29 = vadd.f32 %v2044_v27, %v1305_v30  ;;  %1723 = vmatprep.subr.mxu0 %v2794_v39 }
 0x3ba   : > { %1724 = vmatpush3.msra.mxu0 %v2719_v12 }
 0x3bb   : > { %v1307_v45 = vadd.f32 %v2040_v6, %v1306_v29  ;;  %1393 = vmatmul.mubr.f32.vlgmr.msra.gmra.mxu0 %v1320_v56 }
 0x3bc   : > { %1397 = vmatprep.mubr.f32.mxu0 %v1323_v26 }
 0x3bd   : > { %v1308_v10 = vadd.f32 %v2036_v20, %v1307_v45 }
 0x3bf   : > { %v1309_v7 = vadd.f32 %v2032_v63, %v1308_v10  ;;  %1398 = vmatmul.mubr.f32.gmra.mxu0 %v1322_v23 }
 0x3c0   : > { %1402 = vmatprep.mubr.f32.mxu0 %v1325_v19 }
 0x3c1   : > { %v1310_v28 = vadd.f32 %v2028_v61, %v1309_v7 }
 0x3c3   : > { %v1311_v2 = vadd.f32 %v2024_v41, %v1310_v28  ;;  %1403 = vmatmul.mubr.f32.gmra.mxu0 %v1324_v8 }
 0x3c4   : > { %1407 = vmatprep.mubr.f32.mxu0 %v1327_v38 }
 0x3c5   : > { %v1312_v44 = vadd.f32 %v2020_v42, %v1311_v2 }
 0x3c7   : > { %v1313_v32 = vadd.f32 %v2796_v58, %v1312_v44  ;;  %1408 = vmatmul.mubr.f32.gmra.mxu0 %v1326_v49 }
 0x3c9   : > { %v1314_v36 = vrot.slane %v1313_v32, 4 }
 0x3cb   : > { %v1315_v31 = vadd.f32 %v1314_v36, %v1313_v32 }
 0x3cd   : > { %v1316_v9 = vrot.slane %v1315_v31, 2 }
 0x3cf   : > { %v1317_v59 = vadd.f32 %v1316_v9, %v1315_v31 }
 0x3d1   : > { %v1318_v12 = vrot.slane %v1317_v59, 1 }
 0x3d3   : > { %v1319_v34 = vadd.f32 %v1318_v12, %v1317_v59 }
 0x3d5   : > { %2045 = vrcp.f32 %v1319_v34 }
 0x3e2   : > { %v2046_v13 = vpop.eup %2045 }
 0x47b   : > { %v1725_v11 = vpop.f32.mrf.mxu0 }
 0x47d   : > { %v1726_v33 = vpop.f32.mrf.mxu0 }
 0x47e   : > { %v1727_v48 = vadd.f32 %v1726_v33, %v1725_v11 }
 0x47f   : > { %v1728_v0 = vpop.f32.mrf.mxu0 }
 0x480   : > { %v1415_v14 = vmul.f32 %v2046_v13, %v1727_v48 }
 0x481   : > { %v1729_v35 = vpop.f32.mrf.mxu0 }
 0x482   : > { %1419 = vst [vmem:[%s2422_s11] sm:$0xff] %v1415_v14  ;;  %v1730_v16 = vadd.f32 %v1729_v35, %v1728_v0 }
 0x483   : > { %v1731_v51 = vpop.f32.mrf.mxu0 }
 0x484   : > { %v1416_v17 = vmul.f32 %v2046_v13, %v1730_v16 }
 0x485   : > { %v1732_v18 = vpop.f32.mrf.mxu0 }
 0x486   : > { %1420 = vst [vmem:[%s2422_s11 + $0x8] sm:$0xff] %v1416_v17  ;;  %v1733_v37 = vadd.f32 %v1732_v18, %v1731_v51 }
 0x487   : > { %v1734_v52 = vpop.f32.mrf.mxu0 }
 0x488   : > { %v1417_v21 = vmul.f32 %v2046_v13, %v1733_v37 }
 0x489   : > { %v1735_v40 = vpop.f32.mrf.mxu0 }
 0x48a   : > { %1421 = vst [vmem:[%s2422_s11 + $0x10] sm:$0xff] %v1417_v21  ;;  %v1736_v22 = vadd.f32 %v1735_v40, %v1734_v52 }
 0x48c   : > { %v1418_v50 = vmul.f32 %v2046_v13, %v1736_v22 }
 0x48e   : > { %1422 = vst [vmem:[%s2422_s11 + $0x18] sm:$0xff] %v1418_v50 }
 0x48f   : > { %2114 = shalt.err (!%p2111_p7)
}
 0x490   : > { %s2115_s5 = scalar_lea.hbm %s2822_s16, 512  ;;  %s2119_s21 = scalar_lea.hbm %s2924_s15, 2048 }
 0x491   : > { %p2116_p9 = scmp.ne.s32.totalorder %s2822_s16, %s2115_s5  ;;  %p2120_p2 = scmp.lt.s32.totalorder %s2822_s16, %s2924_s15 }
 0x492   : > { %p2121_p4 = scmp.lt.s32.totalorder %s2119_s21, %s2115_s5 }
 0x493   : > { %p2117_p10 = pnand %p2116_p9, %p2925_p3 }
 0x494   : > { %p2122_p11 = por %p2121_p4, %p2120_p2 }
 0x495   : > { %p2118_p12 = pneg %p2117_p10 }
 0x497   : > { %p2123_p1 = pnand %p2122_p11, %p2118_p12 }
 0x499   : > { %2126 = shalt.err (!%p2123_p1)
}
 0x49a   : > { %s2236_s29 = smov 128   ;;  %s2237_s7 = smov 256  }
 0x49b   : > { %s2238_s10 = smov 8  }
 0x49c   : > { %1863 = dma.vmem_to_hbm [thread:$0]  (%p2925_p3), %s2824_s9, 512, %s2822_s16, %s2829_s24, %s2236_s29, %s2237_s7, %s2238_s10  }
 0x49d PF: > { %s2926_s13 = sld [smem:[#allocation13_spill]]  ;;  %p1880_p0 = scmp.ge.s32.totalorder %s2225_s28, 2 }
 0x49e   : > { %s2927_s17 = sld [smem:[#allocation17_spill]] }
 0x4a3   : > { %s1453_s25 = sand.u32 1, %s2926_s13  }
 0x4a4   : > { %p2928_p13 = scmp.ne.s32.totalorder %s2927_s17, 0  ;;  %s1454_s8 = scalar_lea.sflag [#allocation6], %s1453_s25 }
 0x4a6   : > { %p1874_p5 = pnand %p1880_p0, %p2928_p13 }
 0x4a8   : > { %p1875_p6 = pneg %p1874_p5 }
 0x4aa   : > { %2180 = dma.done.wait (%p1875_p6), %s1454_s8, 512  }
 0x4ab   : > { %2182 = vsyncadd (%p1875_p6), %s1454_s8, 4294966784  ;;  %s22_s28 = sadd.s32 1, %s2225_s28   ;;  %s2929_s24 = sld [smem:[#allocation15_spill]] }
 0x4ac   : > { %p19_p8 = scmp.ge.s32.totalorder %s22_s28, 6   ;;  %s2930_s9 = sld [smem:[#allocation18_spill]] }
 0x4ad   : > { %s2931_s16 = sld [smem:[#allocation19_spill]]  ;;  %s2932_s18 = smov %s2189_s19 }
 0x4ae   : > { %s2933_s19 = smov %s2193_s20  ;;  %s2934_s20 = smov %s2389_s26 }
 0x4af   : > { %s2935_s21 = smov %s2201_s22  ;;  %s2936_s22 = smov %s2205_s23 }
 0x4b0   : > { %s2937_s23 = smov %s2384_s3  ;;  %s2938_s25 = smov %s2221_s27 }
 0x4b1   :  { %21 = sbr.rel (!%p19_p8) target bundleno = 13 (0xd), region = 94 }
 0x4b2   : > { %s2939_s26 = smov %s2930_s9 }
 0x4b3   : > { %s2940_s27 = smov %s2931_s16 }
 0x4b6   :  { %1459 = vsyncpa [#allocation5], 1 }
 0x4b7   :  { %1461 = vsyncpa [#allocation5 + $0x1], 1 }
 0x4b8   :  { %1462 = vsyncpa [#allocation8], 1 }
 0x4b9   :  { %1463 = vsyncpa [#allocation6], 1 }
 0x4ba   :  { %1465 = vsyncpa [#allocation6 + $0x1], 1 }

</bundles_post_ra>
